<compile_context>
chip_gen: v7x
topology: tpu7x:2x2x1
jax: 0.10.0
libtpu: 0.0.40
codegen_flags: <defaults>
</compile_context>

<pallas_src>
import numpy as np
import jax
import jax.numpy as jnp
from jax.experimental import pallas as pl
from jax.experimental.pallas import tpu as pltpu

NB = 8  # images per grid step; keep batch/NB >= 2 so v7x megacore gets work


def _make_kernel(nb):
    r6 = 6 * nb   # rows per conv1 row-phase block
    r4 = 4 * nb   # rows per conv2 output-row-parity block

    def kernel(x1_ref, m1_ref, b1_ref, m2_ref, b2_ref,
               g1_ref, bf1_ref, g2_ref, bf2_ref, out_ref):
        f32 = jnp.float32

        # ---- conv1 (1->10, 5x5): ONE merged-K matmul for the whole tile ----
        # LHS row = m4*6nb + t*nb + i (conv row 4t+m4 of image i), K = 5*28.
        # Result lane = dj*128 + j2*10 + c  (conv output column j = 2*j2+dj).
        y = jnp.dot(x1_ref[...], m1_ref[...], preferred_element_type=f32)   # (24nb,256)

        # fused 2x2 max-pool + bias + relu (bias after max is exact)
        cm = jnp.maximum(y[:, :128], y[:, 128:])                            # column pool
        b1 = b1_ref[...]
        a_e = jnp.maximum(jnp.maximum(cm[0:r6], cm[r6:2 * r6]) + b1, 0.0)    # pooled rows 2t
        a_o = jnp.maximum(jnp.maximum(cm[2 * r6:3 * r6], cm[3 * r6:4 * r6]) + b1, 0.0)
        # a_e/a_o[t*nb+i, j2*10+c] = relu(pool1)[c, 2t(+1), j2] of image i

        # ---- conv2 (10->20, 5x5): merged-K LHS, both parities stacked on M --
        blocks = []
        for p in range(2):                       # conv2 output-row parity
            win = []
            for ki in range(5):
                s = p + ki
                src = a_e if (s % 2) == 0 else a_o
                off = (s // 2) * nb              # sublane-aligned static slice
                win.append(src[off:off + r4, :])
            blocks.append(jnp.concatenate(win, axis=1))                      # (4nb, 640)
        lhs2 = jnp.concatenate(blocks, axis=0)                               # (8nb, 640)
        z = jnp.dot(lhs2, m2_ref[...], preferred_element_type=f32)           # (8nb, 256)

        zp = jnp.maximum(z[0:r4], z[r4:2 * r4])                              # row pool (parity)
        cm2 = jnp.maximum(zp[:, :128], zp[:, 128:])                          # column pool
        a2 = jnp.maximum(cm2 + b2_ref[...], 0.0)                             # (4nb, 128)
        # a2[h*nb+i, w*20+c2] = relu(pool2)[c2, h, w] of image i
        # TODO(synk): Dropout2d / dropout are identity here (eval semantics);
        # training parity would need pltpu.prng_seed / prng_random_bits masks.

        # ---- fc1 (320 -> 50): single batched matmul, K padded to 512 -------
        lhs_fc1 = jnp.concatenate([a2[h * nb:(h + 1) * nb, :] for h in range(4)],
                                  axis=1)                                    # (nb, 512)
        h1 = jnp.maximum(jnp.dot(lhs_fc1, g1_ref[...], preferred_element_type=f32)
                         + bf1_ref[...], 0.0)                                # (nb, 64)

        # ---- fc2 (50 -> 10, lane-padded to 128) + fused log_softmax --------
        logits = jnp.dot(h1, g2_ref[...], preferred_element_type=f32) + bf2_ref[...]
        zmax = jnp.max(logits, axis=-1, keepdims=True)
        ez = jnp.exp(logits - zmax)                                          # EUP
        lse = jnp.log(jnp.sum(ez, axis=-1, keepdims=True))
        out_ref[...] = logits - zmax - lse            # (nb, 128) lane-dense store
        # NOTE: padded output lanes [10:128] hold ~-1e30; the wrapper slices them off.

    return kernel


def pack_params(w1, b1, w2, b2, wfc1, bfc1, wfc2, bfc2):
    """One-time host-side repack of PyTorch-layout weights into the merged-K
    banded 'lowering' matrices consumed by the fused kernel."""
    w1 = np.asarray(w1, np.float32);     b1 = np.asarray(b1, np.float32)
    w2 = np.asarray(w2, np.float32);     b2 = np.asarray(b2, np.float32)
    wfc1 = np.asarray(wfc1, np.float32); bfc1 = np.asarray(bfc1, np.float32)
    wfc2 = np.asarray(wfc2, np.float32); bfc2 = np.asarray(bfc2, np.float32)

    # conv1: K = ki*28 + input-col ; output lanes = dj*128 + j2*10 + c (j = 2*j2+dj)
    m1 = np.zeros((140, 256), np.float32)
    for ki in range(5):
        for dj in range(2):
            for j2 in range(12):
                for kj in range(5):
                    m1[ki * 28 + 2 * j2 + dj + kj,
                       dj * 128 + j2 * 10: dj * 128 + j2 * 10 + 10] = w1[:, 0, ki, kj]
    b1t = np.zeros((1, 128), np.float32)
    for j2 in range(12):
        b1t[0, j2 * 10: j2 * 10 + 10] = b1

    # conv2: K = ki*128 + jin*10 + c1 ; output lanes = dj*128 + j2*20 + c2
    m2 = np.zeros((640, 256), np.float32)
    for ki in range(5):
        for dj in range(2):
            for j2 in range(4):
                for kj in range(5):
                    jin = 2 * j2 + dj + kj
                    for c1 in range(10):
                        m2[ki * 128 + jin * 10 + c1,
                           dj * 128 + j2 * 20: dj * 128 + j2 * 20 + 20] = w2[:, c1, ki, kj]
    b2t = np.zeros((1, 128), np.float32)
    for j2 in range(4):
        b2t[0, j2 * 20: j2 * 20 + 20] = b2

    # fc1: LHS lane = h*128 + w*20 + c2 ; PyTorch flatten f = c2*16 + h*4 + w
    g1 = np.zeros((512, 64), np.float32)
    for h in range(4):
        for w in range(4):
            for c2 in range(20):
                g1[h * 128 + w * 20 + c2, :50] = wfc1[:, c2 * 16 + h * 4 + w]
    bf1 = np.zeros((1, 64), np.float32)
    bf1[0, :50] = bfc1

    # fc2 padded to 128 lanes; padded logits biased to -1e30 (exp -> 0)
    g2 = np.zeros((64, 128), np.float32)
    g2[:50, :10] = wfc2.T
    bf2 = np.full((1, 128), -1e30, np.float32)
    bf2[0, :10] = bfc2

    return tuple(jnp.asarray(a) for a in (m1, b1t, m2, b2t, g1, bf1, g2, bf2))


# conv1 row-window gather (im2row): one cheap wrapper pass, lets conv1 be a
# single merged-K matmul with zero in-kernel window slicing.
_RIDX = (4 * np.arange(6)[None, :, None]           # t
         + np.arange(4)[:, None, None]             # m4 (row phase)
         + np.arange(5)[None, None, :])            # ki            -> (4, 6, 5)


def _im2row(x, nb):
    # x: (B, 1, 28, 28) with B % nb == 0  ->  (B//nb * 24*nb, 140)
    B = x.shape[0]
    g = B // nb
    xg = x[:, 0, :, :][:, _RIDX, :]                        # (B, 4, 6, 5, 28)
    xg = xg.reshape(g, nb, 4, 6, 140).transpose(0, 2, 3, 1, 4)
    return xg.reshape(g * 24 * nb, 140)


def make_net_forward(nb=NB):
    kernel = _make_kernel(nb)

    @jax.jit
    def net_forward(x, packed):
        m1, b1t, m2, b2t, g1, bf1, g2, bf2 = packed
        B = x.shape[0]
        Bp = ((B + nb - 1) // nb) * nb
        if Bp != B:  # pad batch to a multiple of nb (static at trace time)
            x = jnp.pad(x, ((0, Bp - B), (0, 0), (0, 0), (0, 0)))
        G = Bp // nb
        x1 = _im2row(x, nb)                                  # (G*24*nb, 140)

        flops = 2 * G * (24 * nb * 140 * 256 + 8 * nb * 640 * 256
                         + nb * 512 * 64 + nb * 64 * 128)
        bytes_accessed = 4 * (x1.size + m1.size + b1t.size + m2.size + b2t.size
                              + g1.size + bf1.size + g2.size + bf2.size + Bp * 128)

        out = pl.pallas_call(
            kernel,
            out_shape=jax.ShapeDtypeStruct((Bp, 128), jnp.float32),
            grid=(G,),
            in_specs=[
                pl.BlockSpec((24 * nb, 140), lambda g: (g, 0)),   # im2row image tile
                pl.BlockSpec((140, 256), lambda g: (0, 0)),       # conv1 merged-K W (resident)
                pl.BlockSpec((1, 128), lambda g: (0, 0)),         # conv1 bias (lane-tiled)
                pl.BlockSpec((640, 256), lambda g: (0, 0)),       # conv2 merged-K W (resident)
                pl.BlockSpec((1, 128), lambda g: (0, 0)),         # conv2 bias (lane-tiled)
                pl.BlockSpec((512, 64), lambda g: (0, 0)),        # fc1 W (K/N padded)
                pl.BlockSpec((1, 64), lambda g: (0, 0)),          # fc1 bias
                pl.BlockSpec((64, 128), lambda g: (0, 0)),        # fc2 W (lane padded)
                pl.BlockSpec((1, 128), lambda g: (0, 0)),         # fc2 bias (padded -1e30)
            ],
            out_specs=pl.BlockSpec((nb, 128), lambda g: (g, 0)),  # full-tile store
            compiler_params=pltpu.CompilerParams(
                dimension_semantics=("parallel",)),               # v7x: shard batch over TCs
            cost_estimate=pl.CostEstimate(flops=flops, transcendentals=Bp * 129,
                                          bytes_accessed=bytes_accessed),
        )(x1, m1, b1t, m2, b2t, g1, bf1, g2, bf2)

        return out[:B, :10]

    return net_forward


def reference_forward(x, w1, b1, w2, b2, wfc1, bfc1, wfc2, bfc2):
    """Pure-JAX reference matching the PyTorch forward (eval mode)."""
    B = x.shape[0]
    dn = ("NCHW", "OIHW", "NCHW")
    c1 = jax.lax.conv_general_dilated(x, w1, (1, 1), "VALID",
                                      dimension_numbers=dn) + b1[None, :, None, None]
    a1 = jnp.maximum(jnp.max(c1.reshape(B, 10, 12, 2, 12, 2), axis=(3, 5)), 0.0)
    c2 = jax.lax.conv_general_dilated(a1, w2, (1, 1), "VALID",
                                      dimension_numbers=dn) + b2[None, :, None, None]
    a2 = jnp.maximum(jnp.max(c2.reshape(B, 20, 4, 2, 4, 2), axis=(3, 5)), 0.0)
    h = jnp.maximum(a2.reshape(B, 320) @ wfc1.T + bfc1, 0.0)
    z = h @ wfc2.T + bfc2
    return jax.nn.log_softmax(z, axis=-1)


if __name__ == "__main__":
    key = jax.random.PRNGKey(0)
    ks = jax.random.split(key, 9)
    B = 16                                   # grid = B/NB = 2 (both v7x TCs busy)
    x = jax.random.normal(ks[0], (B, 1, 28, 28), jnp.float32)
    w1 = 0.20 * jax.random.normal(ks[1], (10, 1, 5, 5), jnp.float32)
    b1 = 0.10 * jax.random.normal(ks[2], (10,), jnp.float32)
    w2 = 0.06 * jax.random.normal(ks[3], (20, 10, 5, 5), jnp.float32)
    b2 = 0.10 * jax.random.normal(ks[4], (20,), jnp.float32)
    wfc1 = 0.05 * jax.random.normal(ks[5], (50, 320), jnp.float32)
    bfc1 = 0.10 * jax.random.normal(ks[6], (50,), jnp.float32)
    wfc2 = 0.14 * jax.random.normal(ks[7], (10, 50), jnp.float32)
    bfc2 = 0.10 * jax.random.normal(ks[8], (10,), jnp.float32)

    packed = pack_params(w1, b1, w2, b2, wfc1, bfc1, wfc2, bfc2)
    fwd = make_net_forward(NB)
    out = jax.block_until_ready(fwd(x, packed))

    ref = reference_forward(x, w1, b1, w2, b2, wfc1, bfc1, wfc2, bfc2)
    err = float(jnp.max(jnp.abs(out - ref)))
    if out.shape != (B, 10) or not (err < 2e-3):
        raise SystemExit(f"mismatch vs reference: shape={out.shape} max_abs_err={err}")
    print("KERNEL_OK")
</pallas_src>

<mosaic_0001>
module attributes {stable_mosaic.version = 11 : i64} {
  func.func @kernel(%arg0: i32, %arg1: memref<192x140xf32, #tpu.memory_space<vmem>>, %arg2: memref<140x256xf32, #tpu.memory_space<vmem>>, %arg3: memref<1x128xf32, #tpu.memory_space<vmem>>, %arg4: memref<640x256xf32, #tpu.memory_space<vmem>>, %arg5: memref<1x128xf32, #tpu.memory_space<vmem>>, %arg6: memref<512x64xf32, #tpu.memory_space<vmem>>, %arg7: memref<1x64xf32, #tpu.memory_space<vmem>>, %arg8: memref<64x128xf32, #tpu.memory_space<vmem>>, %arg9: memref<1x128xf32, #tpu.memory_space<vmem>>, %arg10: memref<8x128xf32, #tpu.memory_space<vmem>>) attributes {dimension_semantics = [#tpu.dimension_semantics<parallel>], iteration_bounds = array<i64: 2>, scalar_prefetch = 0 : i64, scratch_operands = 0 : i64, tpu.core_type = #tpu.core_type<tc>, window_params = [{transform_indices = @transform_0, window_bounds = array<i64: 192, 140>}, {pipeline_mode = #tpu.pipeline_mode<synchronous>, transform_indices = @transform_1, window_bounds = array<i64: 140, 256>}, {pipeline_mode = #tpu.pipeline_mode<synchronous>, transform_indices = @transform_2, window_bounds = array<i64: 1, 128>}, {pipeline_mode = #tpu.pipeline_mode<synchronous>, transform_indices = @transform_3, window_bounds = array<i64: 640, 256>}, {pipeline_mode = #tpu.pipeline_mode<synchronous>, transform_indices = @transform_4, window_bounds = array<i64: 1, 128>}, {pipeline_mode = #tpu.pipeline_mode<synchronous>, transform_indices = @transform_5, window_bounds = array<i64: 512, 64>}, {pipeline_mode = #tpu.pipeline_mode<synchronous>, transform_indices = @transform_6, window_bounds = array<i64: 1, 64>}, {pipeline_mode = #tpu.pipeline_mode<synchronous>, transform_indices = @transform_7, window_bounds = array<i64: 64, 128>}, {pipeline_mode = #tpu.pipeline_mode<synchronous>, transform_indices = @transform_8, window_bounds = array<i64: 1, 128>}, {transform_indices = @transform_9, window_bounds = array<i64: 8, 128>}]} {
    %c0 = arith.constant 0 : index
    %c0_0 = arith.constant 0 : index
    %0 = vector.load %arg1[%c0, %c0_0] : memref<192x140xf32, #tpu.memory_space<vmem>>, vector<192x140xf32>
    %c0_1 = arith.constant 0 : index
    %c0_2 = arith.constant 0 : index
    %1 = vector.load %arg2[%c0_1, %c0_2] : memref<140x256xf32, #tpu.memory_space<vmem>>, vector<140x256xf32>
    %cst = arith.constant dense<0.000000e+00> : vector<192x256xf32>
    %2 = tpu.matmul %0, %1, %cst {dimension_numbers = #tpu.dot_dimension_numbers<[1], [0], [0], [1], [0, 0, 1, 1], [], []>} : vector<192x140xf32>, vector<140x256xf32>, vector<192x256xf32> -> vector<192x256xf32>
    %3 = vector.extract_strided_slice %2 {offsets = [0, 0], sizes = [192, 128], strides = [1, 1]} : vector<192x256xf32> to vector<192x128xf32>
    %4 = vector.extract_strided_slice %2 {offsets = [0, 128], sizes = [192, 128], strides = [1, 1]} : vector<192x256xf32> to vector<192x128xf32>
    %5 = arith.maximumf %3, %4 : vector<192x128xf32>
    %c0_3 = arith.constant 0 : index
    %c0_4 = arith.constant 0 : index
    %6 = vector.load %arg3[%c0_3, %c0_4] : memref<1x128xf32, #tpu.memory_space<vmem>>, vector<1x128xf32>
    %7 = vector.extract_strided_slice %5 {offsets = [0, 0], sizes = [48, 128], strides = [1, 1]} : vector<192x128xf32> to vector<48x128xf32>
    %8 = vector.extract_strided_slice %5 {offsets = [48, 0], sizes = [48, 128], strides = [1, 1]} : vector<192x128xf32> to vector<48x128xf32>
    %9 = arith.maximumf %7, %8 : vector<48x128xf32>
    %10 = vector.broadcast %6 : vector<1x128xf32> to vector<48x128xf32>
    %11 = arith.addf %9, %10 : vector<48x128xf32>
    %cst_5 = arith.constant 0.000000e+00 : f32
    %12 = vector.broadcast %cst_5 : f32 to vector<48x128xf32>
    %13 = arith.maximumf %11, %12 : vector<48x128xf32>
    %14 = vector.extract_strided_slice %5 {offsets = [96, 0], sizes = [48, 128], strides = [1, 1]} : vector<192x128xf32> to vector<48x128xf32>
    %15 = vector.extract_strided_slice %5 {offsets = [144, 0], sizes = [48, 128], strides = [1, 1]} : vector<192x128xf32> to vector<48x128xf32>
    %16 = arith.maximumf %14, %15 : vector<48x128xf32>
    %17 = vector.broadcast %6 : vector<1x128xf32> to vector<48x128xf32>
    %18 = arith.addf %16, %17 : vector<48x128xf32>
    %cst_6 = arith.constant 0.000000e+00 : f32
    %19 = vector.broadcast %cst_6 : f32 to vector<48x128xf32>
    %20 = arith.maximumf %18, %19 : vector<48x128xf32>
    %21 = vector.extract_strided_slice %13 {offsets = [0, 0], sizes = [32, 128], strides = [1, 1]} : vector<48x128xf32> to vector<32x128xf32>
    %22 = vector.extract_strided_slice %20 {offsets = [0, 0], sizes = [32, 128], strides = [1, 1]} : vector<48x128xf32> to vector<32x128xf32>
    %23 = vector.extract_strided_slice %13 {offsets = [8, 0], sizes = [32, 128], strides = [1, 1]} : vector<48x128xf32> to vector<32x128xf32>
    %24 = vector.extract_strided_slice %20 {offsets = [8, 0], sizes = [32, 128], strides = [1, 1]} : vector<48x128xf32> to vector<32x128xf32>
    %25 = vector.extract_strided_slice %13 {offsets = [16, 0], sizes = [32, 128], strides = [1, 1]} : vector<48x128xf32> to vector<32x128xf32>
    %26 = tpu.concatenate %21, %22, %23, %24, %25 in 1 : vector<32x128xf32>, vector<32x128xf32>, vector<32x128xf32>, vector<32x128xf32>, vector<32x128xf32> -> vector<32x640xf32>
    %27 = vector.extract_strided_slice %20 {offsets = [0, 0], sizes = [32, 128], strides = [1, 1]} : vector<48x128xf32> to vector<32x128xf32>
    %28 = vector.extract_strided_slice %13 {offsets = [8, 0], sizes = [32, 128], strides = [1, 1]} : vector<48x128xf32> to vector<32x128xf32>
    %29 = vector.extract_strided_slice %20 {offsets = [8, 0], sizes = [32, 128], strides = [1, 1]} : vector<48x128xf32> to vector<32x128xf32>
    %30 = vector.extract_strided_slice %13 {offsets = [16, 0], sizes = [32, 128], strides = [1, 1]} : vector<48x128xf32> to vector<32x128xf32>
    %31 = vector.extract_strided_slice %20 {offsets = [16, 0], sizes = [32, 128], strides = [1, 1]} : vector<48x128xf32> to vector<32x128xf32>
    %32 = tpu.concatenate %27, %28, %29, %30, %31 in 1 : vector<32x128xf32>, vector<32x128xf32>, vector<32x128xf32>, vector<32x128xf32>, vector<32x128xf32> -> vector<32x640xf32>
    %33 = tpu.concatenate %26, %32 in 0 : vector<32x640xf32>, vector<32x640xf32> -> vector<64x640xf32>
    %c0_7 = arith.constant 0 : index
    %c0_8 = arith.constant 0 : index
    %34 = vector.load %arg4[%c0_7, %c0_8] : memref<640x256xf32, #tpu.memory_space<vmem>>, vector<640x256xf32>
    %cst_9 = arith.constant dense<0.000000e+00> : vector<64x256xf32>
    %35 = tpu.matmul %33, %34, %cst_9 {dimension_numbers = #tpu.dot_dimension_numbers<[1], [0], [0], [1], [0, 0, 1, 1], [], []>} : vector<64x640xf32>, vector<640x256xf32>, vector<64x256xf32> -> vector<64x256xf32>
    %36 = vector.extract_strided_slice %35 {offsets = [0, 0], sizes = [32, 256], strides = [1, 1]} : vector<64x256xf32> to vector<32x256xf32>
    %37 = vector.extract_strided_slice %35 {offsets = [32, 0], sizes = [32, 256], strides = [1, 1]} : vector<64x256xf32> to vector<32x256xf32>
    %38 = arith.maximumf %36, %37 : vector<32x256xf32>
    %39 = vector.extract_strided_slice %38 {offsets = [0, 0], sizes = [32, 128], strides = [1, 1]} : vector<32x256xf32> to vector<32x128xf32>
    %40 = vector.extract_strided_slice %38 {offsets = [0, 128], sizes = [32, 128], strides = [1, 1]} : vector<32x256xf32> to vector<32x128xf32>
    %41 = arith.maximumf %39, %40 : vector<32x128xf32>
    %c0_10 = arith.constant 0 : index
    %c0_11 = arith.constant 0 : index
    %42 = vector.load %arg5[%c0_10, %c0_11] : memref<1x128xf32, #tpu.memory_space<vmem>>, vector<1x128xf32>
    %43 = vector.broadcast %42 : vector<1x128xf32> to vector<32x128xf32>
    %44 = arith.addf %41, %43 : vector<32x128xf32>
    %cst_12 = arith.constant 0.000000e+00 : f32
    %45 = vector.broadcast %cst_12 : f32 to vector<32x128xf32>
    %46 = arith.maximumf %44, %45 : vector<32x128xf32>
    %47 = vector.extract_strided_slice %46 {offsets = [0, 0], sizes = [8, 128], strides = [1, 1]} : vector<32x128xf32> to vector<8x128xf32>
    %48 = vector.extract_strided_slice %46 {offsets = [8, 0], sizes = [8, 128], strides = [1, 1]} : vector<32x128xf32> to vector<8x128xf32>
    %49 = vector.extract_strided_slice %46 {offsets = [16, 0], sizes = [8, 128], strides = [1, 1]} : vector<32x128xf32> to vector<8x128xf32>
    %50 = vector.extract_strided_slice %46 {offsets = [24, 0], sizes = [8, 128], strides = [1, 1]} : vector<32x128xf32> to vector<8x128xf32>
    %51 = tpu.concatenate %47, %48, %49, %50 in 1 : vector<8x128xf32>, vector<8x128xf32>, vector<8x128xf32>, vector<8x128xf32> -> vector<8x512xf32>
    %c0_13 = arith.constant 0 : index
    %c0_14 = arith.constant 0 : index
    %52 = vector.load %arg6[%c0_13, %c0_14] : memref<512x64xf32, #tpu.memory_space<vmem>>, vector<512x64xf32>
    %cst_15 = arith.constant dense<0.000000e+00> : vector<8x64xf32>
    %53 = tpu.matmul %51, %52, %cst_15 {dimension_numbers = #tpu.dot_dimension_numbers<[1], [0], [0], [1], [0, 0, 1, 1], [], []>} : vector<8x512xf32>, vector<512x64xf32>, vector<8x64xf32> -> vector<8x64xf32>
    %c0_16 = arith.constant 0 : index
    %c0_17 = arith.constant 0 : index
    %54 = vector.load %arg7[%c0_16, %c0_17] : memref<1x64xf32, #tpu.memory_space<vmem>>, vector<1x64xf32>
    %55 = vector.broadcast %54 : vector<1x64xf32> to vector<8x64xf32>
    %56 = arith.addf %53, %55 : vector<8x64xf32>
    %cst_18 = arith.constant 0.000000e+00 : f32
    %57 = vector.broadcast %cst_18 : f32 to vector<8x64xf32>
    %58 = arith.maximumf %56, %57 : vector<8x64xf32>
    %c0_19 = arith.constant 0 : index
    %c0_20 = arith.constant 0 : index
    %59 = vector.load %arg8[%c0_19, %c0_20] : memref<64x128xf32, #tpu.memory_space<vmem>>, vector<64x128xf32>
    %cst_21 = arith.constant dense<0.000000e+00> : vector<8x128xf32>
    %60 = tpu.matmul %58, %59, %cst_21 {dimension_numbers = #tpu.dot_dimension_numbers<[1], [0], [0], [1], [0, 0, 1, 1], [], []>} : vector<8x64xf32>, vector<64x128xf32>, vector<8x128xf32> -> vector<8x128xf32>
    %c0_22 = arith.constant 0 : index
    %c0_23 = arith.constant 0 : index
    %61 = vector.load %arg9[%c0_22, %c0_23] : memref<1x128xf32, #tpu.memory_space<vmem>>, vector<1x128xf32>
    %62 = vector.broadcast %61 : vector<1x128xf32> to vector<8x128xf32>
    %63 = arith.addf %60, %62 : vector<8x128xf32>
    %cst_24 = arith.constant dense<0xFF800000> : vector<8xf32>
    %64 = vector.multi_reduction <maximumf>, %63, %cst_24 [1] : vector<8x128xf32> to vector<8xf32>
    %65 = vector.shape_cast %64 : vector<8xf32> to vector<8x1xf32>
    %66 = vector.broadcast %65 : vector<8x1xf32> to vector<8x128xf32>
    %67 = arith.subf %63, %66 : vector<8x128xf32>
    %68 = math.exp %67 : vector<8x128xf32>
    %cst_25 = arith.constant dense<0.000000e+00> : vector<8xf32>
    %69 = vector.multi_reduction <add>, %68, %cst_25 [1] : vector<8x128xf32> to vector<8xf32>
    %70 = vector.shape_cast %69 : vector<8xf32> to vector<8x1xf32>
    %71 = math.log %70 : vector<8x1xf32>
    %72 = vector.broadcast %65 : vector<8x1xf32> to vector<8x128xf32>
    %73 = arith.subf %63, %72 : vector<8x128xf32>
    %74 = vector.broadcast %71 : vector<8x1xf32> to vector<8x128xf32>
    %75 = arith.subf %73, %74 : vector<8x128xf32>
    %c0_26 = arith.constant 0 : index
    %c0_27 = arith.constant 0 : index
    %76 = vector.load %arg10[%c0_26, %c0_27] : memref<8x128xf32, #tpu.memory_space<vmem>>, vector<8x128xf32>
    tpu.vector_store %arg10[%c0_26, %c0_27], %75 {strides = array<i32>} : memref<8x128xf32, #tpu.memory_space<vmem>>, vector<8x128xf32>,
    return
  }
  func.func @transform_0(%arg0: i32) -> (i32, i32) {
    %c0_i32 = arith.constant 0 : i32
    %c0_i32_0 = arith.constant 0 : i32
    return %arg0, %c0_i32 : i32, i32
  }
  func.func @transform_1(%arg0: i32) -> (i32, i32) {
    %c0_i32 = arith.constant 0 : i32
    %c0_i32_0 = arith.constant 0 : i32
    %c0_i32_1 = arith.constant 0 : i32
    return %c0_i32, %c0_i32_0 : i32, i32
  }
  func.func @transform_2(%arg0: i32) -> (i32, i32) {
    %c0_i32 = arith.constant 0 : i32
    %c0_i32_0 = arith.constant 0 : i32
    %c0_i32_1 = arith.constant 0 : i32
    return %c0_i32, %c0_i32_0 : i32, i32
  }
  func.func @transform_3(%arg0: i32) -> (i32, i32) {
    %c0_i32 = arith.constant 0 : i32
    %c0_i32_0 = arith.constant 0 : i32
    %c0_i32_1 = arith.constant 0 : i32
    return %c0_i32, %c0_i32_0 : i32, i32
  }
  func.func @transform_4(%arg0: i32) -> (i32, i32) {
    %c0_i32 = arith.constant 0 : i32
    %c0_i32_0 = arith.constant 0 : i32
    %c0_i32_1 = arith.constant 0 : i32
    return %c0_i32, %c0_i32_0 : i32, i32
  }
  func.func @transform_5(%arg0: i32) -> (i32, i32) {
    %c0_i32 = arith.constant 0 : i32
    %c0_i32_0 = arith.constant 0 : i32
    %c0_i32_1 = arith.constant 0 : i32
    return %c0_i32, %c0_i32_0 : i32, i32
  }
  func.func @transform_6(%arg0: i32) -> (i32, i32) {
    %c0_i32 = arith.constant 0 : i32
    %c0_i32_0 = arith.constant 0 : i32
    %c0_i32_1 = arith.constant 0 : i32
    return %c0_i32, %c0_i32_0 : i32, i32
  }
  func.func @transform_7(%arg0: i32) -> (i32, i32) {
    %c0_i32 = arith.constant 0 : i32
    %c0_i32_0 = arith.constant 0 : i32
    %c0_i32_1 = arith.constant 0 : i32
    return %c0_i32, %c0_i32_0 : i32, i32
  }
  func.func @transform_8(%arg0: i32) -> (i32, i32) {
    %c0_i32 = arith.constant 0 : i32
    %c0_i32_0 = arith.constant 0 : i32
    %c0_i32_1 = arith.constant 0 : i32
    return %c0_i32, %c0_i32_0 : i32, i32
  }
  func.func @transform_9(%arg0: i32) -> (i32, i32) {
    %c0_i32 = arith.constant 0 : i32
    %c0_i32_0 = arith.constant 0 : i32
    return %arg0, %c0_i32 : i32, i32
  }
}

</mosaic_0001>

<bundles_post_ra>
// kernel: net_forward.1
= control target key start
LH: loop header
LB: loop body
LE: loop exit
PB: predicated region body
PF: predicated region fallthrough
CT: control target
= control target key end

     0   :  { %14 = vsyncpa [#allocation3], 0  ;;  %s3426_s0 = inlined_call_operand.vmem [shape: f32[384,140], index: 0, kind: input, shape index: {}]   ;;  %s3427_s1 = inlined_call_operand.vmem [shape: f32[140,256], index: 1, kind: input, shape index: {}]   ;;  %s3428_s2 = inlined_call_operand.vmem [shape: f32[1,128], index: 2, kind: input, shape index: {}]   ;;  %s3429_s3 = inlined_call_operand.vmem [shape: f32[640,256], index: 3, kind: input, shape index: {}]   ;;  %s3430_s4 = inlined_call_operand.vmem [shape: f32[1,128], index: 4, kind: input, shape index: {}]   ;;  %s3431_s5 = inlined_call_operand.vmem [shape: f32[512,64], index: 5, kind: input, shape index: {}]   ;;  %s3432_s6 = inlined_call_operand.vmem [shape: f32[1,64], index: 6, kind: input, shape index: {}]   ;;  %s3433_s7 = inlined_call_operand.vmem [shape: f32[64,128], index: 7, kind: input, shape index: {}]   ;;  %s3434_s8 = inlined_call_operand.vmem [shape: f32[1,128], index: 8, kind: input, shape index: {}]   ;;  %s3435_s9 = inlined_call_operand.hbm [shape: f32[16,128], index: 9, kind: output, shape index: {}]  }
   0x1   :  { %16 = vsyncpa [#allocation3 + $0x1], 0  ;;  %s2300_s30 = smov 0   ;;  %s2302_s10 = smov 0  }
   0x2   :  { %s2304_s11 = smov 0   ;;  %s2306_s12 = smov 0  }
   0x3 LB: > { %s2321_s13 = sadd.s32 4294967295, %s2243_s12   ;;  %s1687_s14 = sadd.s32 4294967294, %s2243_s12   ;;  %s2243_s12 = sphi %s2306_s12, %s3441_s12   ;;  %s2239_s11 = sphi %s2304_s11, %s3440_s11   ;;  %s2235_s10 = sphi %s2302_s10, %s3439_s10   ;;  %s2231_s30 = sphi %s2300_s30, %s3438_s30  }
   0x4   : > { %s2325_s15 = sadd.s32 1, %s2243_s12   ;;  %s223_s16 = sadd.s32 1, %s2239_s11 }
   0x5   : > { %s220_s17 = ssub.s32 %s2243_s12, %s2325_s15  ;;  %p233_p0 = scmp.ne.s32.totalorder %s2239_s11, %s2235_s10 }
   0x6   : > { %p221_p1 = scmp.eq.s32.totalorder %s220_s17, 0  ;;  %p234_p2 = scmp.eq.s32.totalorder %s2321_s13, 1 }
   0x7   : > { %p239_p3 = scmp.ne.s32.totalorder %s2235_s10, %s2231_s30  ;;  %p240_p4 = scmp.eq.s32.totalorder %s1687_s14, 1 }
   0x8   : > { %s2336_s18 = scalar_select %p221_p1, %s2239_s11, %s223_s16  }
   0x9   : > { %p2338_p5 = por %p234_p2, %p233_p0  ;;  %p2342_p6 = por %p240_p4, %p239_p3 }
   0xa   : > { %p1690_p7 = scmp.ge.s32.totalorder %s2243_s12, 1  ;;  %p292_p8 = scmp.lt.s32.totalorder %s2243_s12, 3 }
   0xc   : > { %p293_p9 = pnand %p1690_p7, %p292_p8 }
   0xd   : > { %v385_v0 = vld [vmem:[%s3427_s1 + $0x8] sm:$0xff] (!%p293_p9)  ;;  %v387_v1 = vld [vmem:[%s3427_s1 + $0x18] sm:$0xff] (!%p293_p9)  ;;  %v384_v2 = vld [vmem:[%s3427_s1] sm:$0xff] (!%p293_p9)  ;;  %s329_s27 = smul.u32 (!%p293_p9), 24, %s2321_s13  ;;  %vm420_vm0 = vcmask (!%p293_p9), 97280   ;;  %vm493_vm1 = vcmask (!%p293_p9), 1043456  }
   0xe   : > { %296 = sbr.rel (%p293_p9) target bundleno = 1477 (0x5c5), region = 56  ;;  %v1828_v3 = vpack.c.bf16 (!%p293_p9), %v387_v1, %v385_v0  ;;  %v386_v4 = vld [vmem:[%s3427_s1 + $0x10] sm:$0xff] (!%p293_p9)  ;;  %v389_v5 = vld [vmem:[%s3427_s1 + $0x28] sm:$0xff] (!%p293_p9)  ;;  %v391_v6 = vld [vmem:[%s3427_s1 + $0x38] sm:$0xff] (!%p293_p9)  ;;  %vm2245_vm2 = vmmov (!%p293_p9), 1   ;;  %vm2248_vm4 = vmmov (!%p293_p9), 0  }
   0xf   : > { %v1830_v7 = vpack.c.bf16 (!%p293_p9), %v386_v4, %v384_v2  ;;  %v1832_v8 = vpack.c.bf16 (!%p293_p9), %v391_v6, %v389_v5  ;;  %v388_v9 = vld [vmem:[%s3427_s1 + $0x20] sm:$0xff] (!%p293_p9)  ;;  %v390_v10 = vld [vmem:[%s3427_s1 + $0x30] sm:$0xff] (!%p293_p9)  ;;  %v393_v11 = vld [vmem:[%s3427_s1 + $0x48] sm:$0xff] (!%p293_p9)  ;;  %p330_p10 = scmp.lt.s32.totalorder (!%p293_p9), %s329_s27, 47  ;;  %vm1529_vm5 = vcmask (!%p293_p9), 523264   ;;  %s326_s24 = sand.u32 (!%p293_p9), 1, %s2235_s10  }
  0x10   : > { %1829 = vmatprep.subr.bf16.mxu0 (!%p293_p9), %v1828_v3  ;;  %v395_v12 = vld [vmem:[%s3427_s1 + $0x58] sm:$0xff] (!%p293_p9)  ;;  %v1834_v13 = vpack.c.bf16 (!%p293_p9), %v390_v10, %v388_v9  ;;  %v392_v15 = vld [vmem:[%s3427_s1 + $0x40] sm:$0xff] (!%p293_p9)  ;;  %v394_v16 = vld [vmem:[%s3427_s1 + $0x50] sm:$0xff] (!%p293_p9)  ;;  %s1691_s25 = sshll.u32 (!%p293_p9), %s326_s24, 3  ;;  %s1615_s16 = scalar_lea.sflag (!%p293_p9), [#allocation3], %s326_s24 }
  0x11   : > { %1831 = vmatpush1.bf16.msra.mxu0 (!%p293_p9), %v1830_v7  ;;  %v1836_v14 = vpack.c.bf16 (!%p293_p9), %v395_v12, %v393_v11  ;;  %v397_v17 = vld [vmem:[%s3427_s1 + $0x68] sm:$0xff] (!%p293_p9)  ;;  %v399_v18 = vld [vmem:[%s3427_s1 + $0x78] sm:$0xff] (!%p293_p9)  ;;  %v1838_v19 = vpack.c.bf16 (!%p293_p9), %v394_v16, %v392_v15  ;;  %v396_v21 = vld [vmem:[%s3427_s1 + $0x60] sm:$0xff] (!%p293_p9)  ;;  %s328_s26 = scalar_lea.vmem (!%p293_p9), [#allocation2], %s1691_s25 }
  0x12   : > { %1833 = vmatprep.subr.bf16.mxu0 (!%p293_p9), %v1832_v8  ;;  %v1840_v20 = vpack.c.bf16 (!%p293_p9), %v399_v18, %v397_v17  ;;  %v398_v22 = vld [vmem:[%s3427_s1 + $0x70] sm:$0xff] (!%p293_p9)  ;;  %v401_v23 = vld [vmem:[%s3427_s1 + $0x88] sm:$0xff] (!%p293_p9)  ;;  %v403_v24 = vld [vmem:[%s3427_s1 + $0x98] sm:$0xff] (!%p293_p9) }
  0x13   : > { %v1842_v25 = vpack.c.bf16 (!%p293_p9), %v398_v22, %v396_v21  ;;  %v1844_v27 = vpack.c.bf16 (!%p293_p9), %v403_v24, %v401_v23  ;;  %v400_v28 = vld [vmem:[%s3427_s1 + $0x80] sm:$0xff] (!%p293_p9)  ;;  %v402_v29 = vld [vmem:[%s3427_s1 + $0x90] sm:$0xff] (!%p293_p9)  ;;  %v405_v30 = vld [vmem:[%s3427_s1 + $0xa8] sm:$0xff] (!%p293_p9) }
  0x14   : > { %v407_v31 = vld [vmem:[%s3427_s1 + $0xb8] sm:$0xff] (!%p293_p9)  ;;  %v1846_v32 = vpack.c.bf16 (!%p293_p9), %v402_v29, %v400_v28  ;;  %v404_v34 = vld [vmem:[%s3427_s1 + $0xa0] sm:$0xff] (!%p293_p9)  ;;  %v406_v35 = vld [vmem:[%s3427_s1 + $0xb0] sm:$0xff] (!%p293_p9) }
  0x15   : > { %s3443_s27 = smov (!%p330_p10, %s329_s27), 47  ;;  %1835 = vmatpush1.bf16.msra.mxu0 %v1834_v13  ;;  %v1848_v33 = vpack.c.bf16 %v407_v31, %v405_v30  ;;  %v409_v36 = vld [vmem:[%s3427_s1 + $0xc8] sm:$0xff]  ;;  %v411_v37 = vld [vmem:[%s3427_s1 + $0xd8] sm:$0xff]  ;;  %v1850_v38 = vpack.c.bf16 %v406_v35, %v404_v34  ;;  %v408_v40 = vld [vmem:[%s3427_s1 + $0xc0] sm:$0xff] }
  0x16   : > { %s1729_s28 = sshll.u32 %s3443_s27, 4  ;;  %1837 = vmatprep.subr.bf16.mxu0 %v1836_v14  ;;  %v1852_v39 = vpack.c.bf16 %v411_v37, %v409_v36  ;;  %v410_v41 = vld [vmem:[%s3427_s1 + $0xd0] sm:$0xff]  ;;  %v413_v42 = vld [vmem:[%s3427_s1 + $0xe8] sm:$0xff]  ;;  %v415_v43 = vld [vmem:[%s3427_s1 + $0xf8] sm:$0xff]  ;;  %s1726_s27 = sshll.u32 %s2321_s13, 7 }
  0x17   : > { %s2400_s23 = scalar_lea.vmem %s3426_s0, %s1729_s28  ;;  %v1854_v44 = vpack.c.bf16 %v410_v41, %v408_v40  ;;  %v1856_v45 = vpack.c.bf16 %v415_v43, %v413_v42  ;;  %v412_v46 = vld [vmem:[%s3427_s1 + $0xe0] sm:$0xff]  ;;  %v414_v47 = vld [vmem:[%s3427_s1 + $0xf0] sm:$0xff]  ;;  %v417_v48 = vld [vmem:[%s3427_s1 + $0x108] sm:$0xff]  ;;  %s3384_s28 = scalar_lea.hbm %s3435_s9, %s1726_s27 }
  0x18   : > { %v337_v26 = vld [vmem:[%s2400_s23 + $0x8] sm:$0xff]  ;;  %v419_v49 = vld [vmem:[%s3427_s1 + $0x118] sm:$0xf]  ;;  %v1858_v50 = vpack.c.bf16 %v414_v47, %v412_v46  ;;  %v416_v52 = vld [vmem:[%s3427_s1 + $0x100] sm:$0xff]  ;;  %s2249_s13 = smov [#allocation2]  }
  0x19   : > { %1839 = vmatpush1.bf16.msra.mxu0 %v1838_v19  ;;  %1696 = vmatprep.mubr.msk.f32.mxu0 %vm420_vm0, %v337_v26  ;;  %v1860_v51 = vpack.c.bf16 %v419_v49, %v417_v48  ;;  %v418_v53 = vld [vmem:[%s3427_s1 + $0x110] sm:$0xf]  ;;  %vm1861_vm3 = vmpackc.low %vm493_vm1, %vm2245_vm2  ;;  %v336_v55 = vld [vmem:[%s2400_s23] sm:$0xff]  ;;  %s2185_s21 = sshll.u32 %s2249_s13, 4  ;;  %s2186_s21 = int_to_ptr.vmem [resolvable:$false] %s2185_s21 }
  0x1a   : > { %1841 = vmatprep.subr.bf16.mxu0 %v1840_v20  ;;  %v1863_v54 = vpack.c.bf16 %v418_v53, %v416_v52  ;;  %v339_v56 = vld [vmem:[%s2400_s23 + $0x18] sm:$0xff]  ;;  %v338_v57 = vld [vmem:[%s2400_s23 + $0x10] sm:$0xff]  ;;  %v341_v58 = vld [vmem:[%s2400_s23 + $0x28] sm:$0xff]  ;;  %s2187_s22 = scalar_lea.vmem %s2186_s21, 256 }
  0x1b   : > { %v340_v59 = vld [vmem:[%s2400_s23 + $0x20] sm:$0xff]  ;;  %v343_v60 = vld [vmem:[%s2400_s23 + $0x38] sm:$0xff]  ;;  %v342_v61 = vld [vmem:[%s2400_s23 + $0x30] sm:$0xff] }
  0x1c   : > { %v345_v62 = vld [vmem:[%s2400_s23 + $0x48] sm:$0xff]  ;;  %v344_v63 = vld [vmem:[%s2400_s23 + $0x40] sm:$0xff]  ;;  %v347_v0 = vld [vmem:[%s2400_s23 + $0x58] sm:$0xff] }
  0x1d   : > { %1843 = vmatpush1.bf16.msra.mxu0 %v1842_v25  ;;  %v346_v1 = vld [vmem:[%s2400_s23 + $0x50] sm:$0xff]  ;;  %v349_v2 = vld [vmem:[%s2400_s23 + $0x68] sm:$0xff]  ;;  %v348_v3 = vld [vmem:[%s2400_s23 + $0x60] sm:$0xff] }
  0x1e   : > { %1845 = vmatprep.subr.bf16.mxu0 %v1844_v27  ;;  %v351_v4 = vld [vmem:[%s2400_s23 + $0x78] sm:$0xff]  ;;  %v350_v5 = vld [vmem:[%s2400_s23 + $0x70] sm:$0xff]  ;;  %v353_v6 = vld [vmem:[%s2400_s23 + $0x88] sm:$0xff] }
  0x1f   : > { %v352_v7 = vld [vmem:[%s2400_s23 + $0x80] sm:$0xff]  ;;  %v355_v8 = vld [vmem:[%s2400_s23 + $0x98] sm:$0xff]  ;;  %v354_v9 = vld [vmem:[%s2400_s23 + $0x90] sm:$0xff] }
  0x20   : > { %v357_v10 = vld [vmem:[%s2400_s23 + $0xa8] sm:$0xff]  ;;  %v356_v11 = vld [vmem:[%s2400_s23 + $0xa0] sm:$0xff]  ;;  %v359_v12 = vld [vmem:[%s2400_s23 + $0xb8] sm:$0xff] }
  0x21   : > { %1847 = vmatpush1.bf16.msra.mxu0 %v1846_v32  ;;  %v358_v13 = vld [vmem:[%s2400_s23 + $0xb0] sm:$0xff]  ;;  %v361_v14 = vld [vmem:[%s2400_s23 + $0xc8] sm:$0xff]  ;;  %v360_v15 = vld [vmem:[%s2400_s23 + $0xc0] sm:$0xff] }
  0x22   : > { %1849 = vmatprep.subr.bf16.mxu0 %v1848_v33  ;;  %v363_v16 = vld [vmem:[%s2400_s23 + $0xd8] sm:$0xff]  ;;  %v362_v17 = vld [vmem:[%s2400_s23 + $0xd0] sm:$0xff]  ;;  %v365_v18 = vld [vmem:[%s2400_s23 + $0xe8] sm:$0xff] }
  0x23   : > { %v364_v19 = vld [vmem:[%s2400_s23 + $0xe0] sm:$0xff]  ;;  %v367_v20 = vld [vmem:[%s2400_s23 + $0xf8] sm:$0xff]  ;;  %v366_v21 = vld [vmem:[%s2400_s23 + $0xf0] sm:$0xff] }
  0x24   : > { %v369_v22 = vld [vmem:[%s2400_s23 + $0x108] sm:$0xff]  ;;  %v368_v23 = vld [vmem:[%s2400_s23 + $0x100] sm:$0xff]  ;;  %v371_v24 = vld [vmem:[%s2400_s23 + $0x118] sm:$0xff] }
  0x25   : > { %1851 = vmatpush1.bf16.msra.mxu0 %v1850_v38  ;;  %v370_v25 = vld [vmem:[%s2400_s23 + $0x110] sm:$0xff]  ;;  %v373_v26 = vld [vmem:[%s2400_s23 + $0x128] sm:$0xff]  ;;  %v372_v27 = vld [vmem:[%s2400_s23 + $0x120] sm:$0xff] }
  0x26   : > { %1853 = vmatprep.subr.bf16.mxu0 %v1852_v39  ;;  %v375_v28 = vld [vmem:[%s2400_s23 + $0x138] sm:$0xff]  ;;  %v374_v29 = vld [vmem:[%s2400_s23 + $0x130] sm:$0xff]  ;;  %v377_v30 = vld [vmem:[%s2400_s23 + $0x148] sm:$0xff] }
  0x27   : > { %v376_v31 = vld [vmem:[%s2400_s23 + $0x140] sm:$0xff]  ;;  %v379_v32 = vld [vmem:[%s2400_s23 + $0x158] sm:$0xff]  ;;  %v378_v33 = vld [vmem:[%s2400_s23 + $0x150] sm:$0xff] }
  0x28   : > { %v381_v34 = vld [vmem:[%s2400_s23 + $0x168] sm:$0xff]  ;;  %v380_v35 = vld [vmem:[%s2400_s23 + $0x160] sm:$0xff]  ;;  %v383_v36 = vld [vmem:[%s2400_s23 + $0x178] sm:$0xff] }
  0x29   : > { %1855 = vmatpush1.bf16.msra.mxu0 %v1854_v44  ;;  %v382_v37 = vld [vmem:[%s2400_s23 + $0x170] sm:$0xff]  ;;  %v777_v38 = vld [vmem:[%s3429_s3 + $0x8] sm:$0xff]  ;;  %v779_v39 = vld [vmem:[%s3429_s3 + $0x18] sm:$0xff]  ;;  %s1628_s23 = sshll.u32 %s328_s26, 4  ;;  %s3386_s23 = int_to_ptr.vmem [resolvable:$true] %s1628_s23 }
  0x2a   : > { %1857 = vmatprep.subr.bf16.mxu0 %v1856_v45  ;;  %v1866_v40 = vpack.c.bf16 %v779_v39, %v777_v38  ;;  %v776_v41 = vld [vmem:[%s3429_s3] sm:$0xff]  ;;  %v778_v42 = vld [vmem:[%s3429_s3 + $0x10] sm:$0xff]  ;;  %v781_v44 = vld [vmem:[%s3429_s3 + $0x28] sm:$0xff]  ;;  %s2181_s17 = scalar_lea.vmem %s3386_s23, 128  ;;  %p2188_p0 = scmp.lt.s32.totalorder %s3386_s23, %s2186_s21 }
  0x2b   : > { %v1868_v43 = vpack.c.bf16 %v778_v42, %v776_v41  ;;  %v783_v45 = vld [vmem:[%s3429_s3 + $0x38] sm:$0xff]  ;;  %v780_v47 = vld [vmem:[%s3429_s3 + $0x20] sm:$0xff]  ;;  %v782_v48 = vld [vmem:[%s3429_s3 + $0x30] sm:$0xff]  ;;  %p2182_p11 = scmp.ne.s32.totalorder %s3386_s23, %s2181_s17  ;;  %p2189_p1 = scmp.lt.s32.totalorder %s2187_s22, %s2181_s17 }
  0x2c   : > { %1867 = vmatprep.subr.bf16.mxu1 %v1866_v40  ;;  %v1870_v46 = vpack.c.bf16 %v783_v45, %v781_v44  ;;  %v1872_v49 = vpack.c.bf16 %v782_v48, %v780_v47  ;;  %v784_v53 = vld [vmem:[%s3429_s3 + $0x40] sm:$0xff]  ;;  %v818_v38 = vld [vmem:[%s3429_s3 + $0x150] sm:$0xff]  ;;  %v821_v40 = vld [vmem:[%s3429_s3 + $0x168] sm:$0xff] }
  0x2d   : > { %1859 = vmatpush1.bf16.msra.mxu0 %v1858_v50  ;;  %1869 = vmatpush1.bf16.msra.mxu1 %v1868_v43  ;;  %v785_v50 = vld [vmem:[%s3429_s3 + $0x48] sm:$0xff]  ;;  %v823_v41 = vld [vmem:[%s3429_s3 + $0x178] sm:$0xff]  ;;  %v820_v43 = vld [vmem:[%s3429_s3 + $0x160] sm:$0xff]  ;;  %p2183_p12 = pnand %p2182_p11, %p2338_p5  ;;  %p2190_p2 = por %p2189_p1, %p2188_p0 }
  0x2e   : > { %1862 = vmatprep.subr.msk.bf16.mxu0 %vm1861_vm3, %v1860_v51  ;;  %1871 = vmatprep.subr.bf16.mxu1 %v1870_v46  ;;  %v787_v51 = vld [vmem:[%s3429_s3 + $0x58] sm:$0xff]  ;;  %v1910_v42 = vpack.c.bf16 %v823_v41, %v821_v40  ;;  %v822_v44 = vld [vmem:[%s3429_s3 + $0x170] sm:$0xff]  ;;  %v825_v46 = vld [vmem:[%s3429_s3 + $0x188] sm:$0xff] }
  0x2f   : > { %v1874_v52 = vpack.c.bf16 %v787_v51, %v785_v50  ;;  %v1912_v45 = vpack.c.bf16 %v822_v44, %v820_v43  ;;  %v827_v47 = vld [vmem:[%s3429_s3 + $0x198] sm:$0xff]  ;;  %v826_v50 = vld [vmem:[%s3429_s3 + $0x190] sm:$0xff]  ;;  %p2184_p13 = pneg %p2183_p12 }
  0x30   : > { %v1914_v48 = vpack.c.bf16 %v827_v47, %v825_v46 }
  0x31   : > { %1865 = vmatpush1.bf16.msk.msra.mxu0 %vm1861_vm3, %v1863_v54  ;;  %1873 = vmatpush1.bf16.msra.mxu1 %v1872_v49  ;;  %v786_v54 = vld [vmem:[%s3429_s3 + $0x50] sm:$0xff]  ;;  %v824_v49 = vld [vmem:[%s3429_s3 + $0x180] sm:$0xff]  ;;  %p2191_p3 = pnand %p2190_p2, %p2184_p13 }
  0x32   : > { %1875 = vmatprep.subr.bf16.mxu1 %v1874_v52  ;;  %v1916_v51 = vpack.c.bf16 %v826_v50, %v824_v49  ;;  %v829_v52 = vld [vmem:[%s3429_s3 + $0x1a8] sm:$0xff] }
  0x34   : > { %565 = vmatmul.mubr.f32.vlgmr.msra.gmra.mrb[0].mxu0 %v336_v55  ;;  %v1876_v55 = vpack.c.bf16 %v786_v54, %v784_v53  ;;  %v831_v53 = vld [vmem:[%s3429_s3 + $0x1b8] sm:$0xff] }
  0x35   : > { %1697 = vmatprep.mubr.msk.f32.mxu0 %vm420_vm0, %v339_v56  ;;  %v789_v56 = vld [vmem:[%s3429_s3 + $0x68] sm:$0xff]  ;;  %v1918_v54 = vpack.c.bf16 %v831_v53, %v829_v52 }
  0x36   : > { %1877 = vmatpush1.bf16.msra.mxu1 %v1876_v55  ;;  %v828_v55 = vld [vmem:[%s3429_s3 + $0x1a0] sm:$0xff] }
  0x38   : > { %571 = vmatmul.mubr.f32.gmra.mrb[2].mxu0 %v338_v57  ;;  %v791_v57 = vld [vmem:[%s3429_s3 + $0x78] sm:$0xff] }
  0x39   : > { %1698 = vmatprep.mubr.msk.f32.mxu0 %vm420_vm0, %v341_v58  ;;  %v1878_v58 = vpack.c.bf16 %v791_v57, %v789_v56  ;;  %v830_v56 = vld [vmem:[%s3429_s3 + $0x1b0] sm:$0xff] }
  0x3a   : > { %v1920_v57 = vpack.c.bf16 %v830_v56, %v828_v55 }
  0x3b   : > { %1879 = vmatprep.subr.bf16.mxu1 %v1878_v58  ;;  %v833_v58 = vld [vmem:[%s3429_s3 + $0x1c8] sm:$0xff] }
  0x3c   : > { %577 = vmatmul.mubr.f32.gmra.mrb[4].mxu0 %v340_v59  ;;  %v788_v59 = vld [vmem:[%s3429_s3 + $0x60] sm:$0xff] }
  0x3d   : > { %1699 = vmatprep.mubr.msk.f32.mxu0 %vm420_vm0, %v343_v60  ;;  %v790_v60 = vld [vmem:[%s3429_s3 + $0x70] sm:$0xff] }
  0x40   : > { %583 = vmatmul.mubr.f32.gmra.mrb[6].mxu0 %v342_v61  ;;  %v1880_v61 = vpack.c.bf16 %v790_v60, %v788_v59  ;;  %v835_v59 = vld [vmem:[%s3429_s3 + $0x1d8] sm:$0xff] }
  0x41   : > { %1700 = vmatprep.mubr.msk.f32.mxu0 %vm420_vm0, %v345_v62  ;;  %v793_v62 = vld [vmem:[%s3429_s3 + $0x88] sm:$0xff]  ;;  %v1922_v60 = vpack.c.bf16 %v835_v59, %v833_v58 }
  0x42   : > { %1881 = vmatpush1.bf16.msra.mxu1 %v1880_v61  ;;  %v832_v61 = vld [vmem:[%s3429_s3 + $0x1c0] sm:$0xff] }
  0x44   : > { %589 = vmatmul.mubr.f32.gmra.mrb[8].mxu0 %v344_v63  ;;  %v795_v63 = vld [vmem:[%s3429_s3 + $0x98] sm:$0xff] }
  0x45   : > { %1701 = vmatprep.mubr.msk.f32.mxu0 %vm420_vm0, %v347_v0  ;;  %v1882_v0 = vpack.c.bf16 %v795_v63, %v793_v62  ;;  %v834_v62 = vld [vmem:[%s3429_s3 + $0x1d0] sm:$0xff] }
  0x46   : > { %v1924_v63 = vpack.c.bf16 %v834_v62, %v832_v61 }
  0x47   : > { %1883 = vmatprep.subr.bf16.mxu1 %v1882_v0  ;;  %v837_v0 = vld [vmem:[%s3429_s3 + $0x1e8] sm:$0xff] }
  0x48   : > { %595 = vmatmul.mubr.f32.gmra.mrb[10].mxu0 %v346_v1  ;;  %v792_v1 = vld [vmem:[%s3429_s3 + $0x80] sm:$0xff] }
  0x49   : > { %1702 = vmatprep.mubr.msk.f32.mxu0 %vm420_vm0, %v349_v2  ;;  %v794_v2 = vld [vmem:[%s3429_s3 + $0x90] sm:$0xff] }
  0x4c   : > { %601 = vmatmul.mubr.f32.gmra.mrb[12].mxu0 %v348_v3  ;;  %v1884_v3 = vpack.c.bf16 %v794_v2, %v792_v1  ;;  %v839_v1 = vld [vmem:[%s3429_s3 + $0x1f8] sm:$0xff] }
  0x4d   : > { %1703 = vmatprep.mubr.msk.f32.mxu0 %vm420_vm0, %v351_v4  ;;  %v797_v4 = vld [vmem:[%s3429_s3 + $0xa8] sm:$0xff]  ;;  %v1926_v2 = vpack.c.bf16 %v839_v1, %v837_v0 }
  0x4e   : > { %1885 = vmatpush1.bf16.msra.mxu1 %v1884_v3  ;;  %v836_v3 = vld [vmem:[%s3429_s3 + $0x1e0] sm:$0xff] }
  0x50   : > { %607 = vmatmul.mubr.f32.gmra.mrb[14].mxu0 %v350_v5  ;;  %v799_v5 = vld [vmem:[%s3429_s3 + $0xb8] sm:$0xff] }
  0x51   : > { %1704 = vmatprep.mubr.msk.f32.mxu0 %vm420_vm0, %v353_v6  ;;  %v1886_v6 = vpack.c.bf16 %v799_v5, %v797_v4  ;;  %v838_v4 = vld [vmem:[%s3429_s3 + $0x1f0] sm:$0xff] }
  0x52   : > { %v1928_v5 = vpack.c.bf16 %v838_v4, %v836_v3 }
  0x53   : > { %1887 = vmatprep.subr.bf16.mxu1 %v1886_v6  ;;  %v841_v6 = vld [vmem:[%s3429_s3 + $0x208] sm:$0xff] }
  0x54   : > { %613 = vmatmul.mubr.f32.gmra.mrb[16].mxu0 %v352_v7  ;;  %v796_v7 = vld [vmem:[%s3429_s3 + $0xa0] sm:$0xff] }
  0x55   : > { %1705 = vmatprep.mubr.msk.f32.mxu0 %vm420_vm0, %v355_v8  ;;  %v798_v8 = vld [vmem:[%s3429_s3 + $0xb0] sm:$0xff] }
  0x58   : > { %619 = vmatmul.mubr.f32.gmra.mrb[18].mxu0 %v354_v9  ;;  %v1888_v9 = vpack.c.bf16 %v798_v8, %v796_v7  ;;  %v843_v7 = vld [vmem:[%s3429_s3 + $0x218] sm:$0xff] }
  0x59   : > { %1706 = vmatprep.mubr.msk.f32.mxu0 %vm420_vm0, %v357_v10  ;;  %v801_v10 = vld [vmem:[%s3429_s3 + $0xc8] sm:$0xff]  ;;  %v1930_v8 = vpack.c.bf16 %v843_v7, %v841_v6  ;;  %v2763_v7 = vld [vmem:[%s3428_s2] ss:$0 sm:$0xff] }
  0x5a   : > { %1889 = vmatpush1.bf16.msra.mxu1 %v1888_v9 }
  0x5c   : > { %625 = vmatmul.mubr.f32.gmra.mrb[20].mxu0 %v356_v11  ;;  %v803_v11 = vld [vmem:[%s3429_s3 + $0xd8] sm:$0xff] }
  0x5d   : > { %1707 = vmatprep.mubr.msk.f32.mxu0 %vm420_vm0, %v359_v12  ;;  %v1890_v12 = vpack.c.bf16 %v803_v11, %v801_v10 }
  0x5f   : > { %1891 = vmatprep.subr.bf16.mxu1 %v1890_v12 }
  0x60   : > { %631 = vmatmul.mubr.f32.gmra.mrb[22].mxu0 %v358_v13  ;;  %v800_v13 = vld [vmem:[%s3429_s3 + $0xc0] sm:$0xff] }
  0x61   : > { %1708 = vmatprep.mubr.msk.f32.mxu0 %vm420_vm0, %v361_v14  ;;  %v802_v14 = vld [vmem:[%s3429_s3 + $0xd0] sm:$0xff] }
  0x64   : > { %637 = vmatmul.mubr.f32.gmra.mrb[24].mxu0 %v360_v15  ;;  %v1892_v15 = vpack.c.bf16 %v802_v14, %v800_v13 }
  0x65   : > { %1709 = vmatprep.mubr.msk.f32.mxu0 %vm420_vm0, %v363_v16  ;;  %v805_v16 = vld [vmem:[%s3429_s3 + $0xe8] sm:$0xff] }
  0x66   : > { %1893 = vmatpush1.bf16.msra.mxu1 %v1892_v15 }
  0x68   : > { %643 = vmatmul.mubr.f32.gmra.mrb[26].mxu0 %v362_v17  ;;  %v807_v17 = vld [vmem:[%s3429_s3 + $0xf8] sm:$0xff] }
  0x69   : > { %1710 = vmatprep.mubr.msk.f32.mxu0 %vm420_vm0, %v365_v18  ;;  %v1894_v18 = vpack.c.bf16 %v807_v17, %v805_v16 }
  0x6b   : > { %1895 = vmatprep.subr.bf16.mxu1 %v1894_v18 }
  0x6c   : > { %649 = vmatmul.mubr.f32.gmra.mrb[28].mxu0 %v364_v19  ;;  %v804_v19 = vld [vmem:[%s3429_s3 + $0xe0] sm:$0xff] }
  0x6d   : > { %1711 = vmatprep.mubr.msk.f32.mxu0 %vm420_vm0, %v367_v20  ;;  %v806_v20 = vld [vmem:[%s3429_s3 + $0xf0] sm:$0xff] }
  0x70   : > { %655 = vmatmul.mubr.f32.gmra.mrb[30].mxu0 %v366_v21  ;;  %v1896_v21 = vpack.c.bf16 %v806_v20, %v804_v19 }
  0x71   : > { %1712 = vmatprep.mubr.msk.f32.mxu0 %vm420_vm0, %v369_v22  ;;  %v809_v22 = vld [vmem:[%s3429_s3 + $0x108] sm:$0xff] }
  0x72   : > { %1897 = vmatpush1.bf16.msra.mxu1 %v1896_v21 }
  0x74   : > { %661 = vmatmul.mubr.f32.gmra.mrb[32].mxu0 %v368_v23  ;;  %v811_v23 = vld [vmem:[%s3429_s3 + $0x118] sm:$0xff] }
  0x75   : > { %1713 = vmatprep.mubr.msk.f32.mxu0 %vm420_vm0, %v371_v24  ;;  %v1898_v24 = vpack.c.bf16 %v811_v23, %v809_v22 }
  0x77   : > { %1899 = vmatprep.subr.bf16.mxu1 %v1898_v24 }
  0x78   : > { %667 = vmatmul.mubr.f32.gmra.mrb[34].mxu0 %v370_v25  ;;  %v808_v25 = vld [vmem:[%s3429_s3 + $0x100] sm:$0xff] }
  0x79   : > { %1714 = vmatprep.mubr.msk.f32.mxu0 %vm420_vm0, %v373_v26  ;;  %v810_v26 = vld [vmem:[%s3429_s3 + $0x110] sm:$0xff] }
  0x7c   : > { %673 = vmatmul.mubr.f32.gmra.mrb[36].mxu0 %v372_v27  ;;  %v1900_v27 = vpack.c.bf16 %v810_v26, %v808_v25 }
  0x7d   : > { %1715 = vmatprep.mubr.msk.f32.mxu0 %vm420_vm0, %v375_v28  ;;  %v813_v28 = vld [vmem:[%s3429_s3 + $0x128] sm:$0xff] }
  0x7e   : > { %1901 = vmatpush1.bf16.msra.mxu1 %v1900_v27 }
  0x80   : > { %679 = vmatmul.mubr.f32.gmra.mrb[38].mxu0 %v374_v29  ;;  %v815_v29 = vld [vmem:[%s3429_s3 + $0x138] sm:$0xff] }
  0x81   : > { %1716 = vmatprep.mubr.msk.f32.mxu0 %vm420_vm0, %v377_v30  ;;  %v1902_v30 = vpack.c.bf16 %v815_v29, %v813_v28 }
  0x83   : > { %1903 = vmatprep.subr.bf16.mxu1 %v1902_v30 }
  0x84   : > { %685 = vmatmul.mubr.f32.gmra.mrb[40].mxu0 %v376_v31  ;;  %v812_v31 = vld [vmem:[%s3429_s3 + $0x120] sm:$0xff] }
  0x85   : > { %1717 = vmatprep.mubr.msk.f32.mxu0 %vm420_vm0, %v379_v32  ;;  %v814_v32 = vld [vmem:[%s3429_s3 + $0x130] sm:$0xff] }
  0x88   : > { %691 = vmatmul.mubr.f32.gmra.mrb[42].mxu0 %v378_v33  ;;  %v1904_v33 = vpack.c.bf16 %v814_v32, %v812_v31 }
  0x89   : > { %1718 = vmatprep.mubr.msk.f32.mxu0 %vm420_vm0, %v381_v34  ;;  %v817_v34 = vld [vmem:[%s3429_s3 + $0x148] sm:$0xff] }
  0x8a   : > { %1905 = vmatpush1.bf16.msra.mxu1 %v1904_v33 }
  0x8c   : > { %697 = vmatmul.mubr.f32.gmra.mrb[44].mxu0 %v380_v35  ;;  %v819_v35 = vld [vmem:[%s3429_s3 + $0x158] sm:$0xff] }
  0x8d   : > { %1719 = vmatprep.mubr.msk.f32.mxu0 %vm420_vm0, %v383_v36  ;;  %v1906_v36 = vpack.c.bf16 %v819_v35, %v817_v34 }
  0x8f   : > { %1907 = vmatprep.subr.bf16.mxu1 %v1906_v36 }
  0x90   : > { %703 = vmatmul.mubr.f32.gmra.mrb[46].mxu0 %v382_v37  ;;  %v816_v37 = vld [vmem:[%s3429_s3 + $0x140] sm:$0xff] }
  0x91   : > { %v1908_v39 = vpack.c.bf16 %v818_v38, %v816_v37 }
  0x93   : > { %1909 = vmatpush1.bf16.msra.mxu1 %v1908_v39 }
  0x94   : > { %1911 = vmatprep.subr.bf16.mxu1 %v1910_v42 }
  0x97   : > { %1913 = vmatpush1.bf16.msra.mxu1 %v1912_v45 }
  0x98   : > { %1915 = vmatprep.subr.bf16.mxu1 %v1914_v48 }
  0x9b   : > { %1917 = vmatpush1.bf16.msra.mxu1 %v1916_v51 }
  0x9c   : > { %1919 = vmatprep.subr.bf16.mxu1 %v1918_v54 }
  0x9f   : > { %1921 = vmatpush1.bf16.msra.mxu1 %v1920_v57 }
  0xa0   : > { %1923 = vmatprep.subr.bf16.mxu1 %v1922_v60 }
  0xa3   : > { %1925 = vmatpush1.bf16.msra.mxu1 %v1924_v63 }
  0xa4   : > { %1927 = vmatprep.subr.bf16.mxu1 %v1926_v2 }
  0xa7   : > { %1929 = vmatpush1.bf16.msra.mxu1 %v1928_v5 }
  0xa8   : > { %1931 = vmatprep.subr.bf16.mxu1 %v1930_v8 }
 0x107   : > { %v566_v9 = vpop.f32.mrb[0].mxu0 }
 0x108   : > { %v568_v10 = vpop.f32.mrb[1].mxu0 }
 0x109   : > { %v709_v11 = vmax.f32 %v566_v9, %v568_v10 }
 0x10b   : > { %v572_v12 = vpop.f32.mrb[2].mxu0 }
 0x10c   : > { %v574_v13 = vpop.f32.mrb[3].mxu0 }
 0x10d   : > { %v710_v14 = vmax.f32 %v572_v12, %v574_v13  ;;  %v842_v12 = vld [vmem:[%s3429_s3 + $0x210] sm:$0xff] }
 0x10f   : > { %v578_v15 = vpop.f32.mrb[4].mxu0 }
 0x110   : > { %v580_v16 = vpop.f32.mrb[5].mxu0 }
 0x111   : > { %v711_v17 = vmax.f32 %v578_v15, %v580_v16  ;;  %v845_v15 = vld [vmem:[%s3429_s3 + $0x228] sm:$0xff]  ;;  %v847_v16 = vld [vmem:[%s3429_s3 + $0x238] sm:$0xff] }
 0x113   : > { %v584_v18 = vpop.f32.mrb[6].mxu0 }
 0x114   : > { %v586_v19 = vpop.f32.mrb[7].mxu0 }
 0x115   : > { %v712_v20 = vmax.f32 %v584_v18, %v586_v19 }
 0x117   : > { %v590_v21 = vpop.f32.mrb[8].mxu0 }
 0x118   : > { %v592_v22 = vpop.f32.mrb[9].mxu0 }
 0x119   : > { %v713_v23 = vmax.f32 %v590_v21, %v592_v22  ;;  %v846_v21 = vld [vmem:[%s3429_s3 + $0x230] sm:$0xff]  ;;  %v1318_v22 = vld [vmem:[%s3431_s5 + $0x80] sm:$0xff] }
 0x11b   : > { %v596_v24 = vpop.f32.mrb[10].mxu0 }
 0x11c   : > { %v598_v25 = vpop.f32.mrb[11].mxu0 }
 0x11d   : > { %v714_v26 = vmax.f32 %v596_v24, %v598_v25  ;;  %v1302_v24 = vld [vmem:[%s3431_s5] sm:$0xff] }
 0x11f   : > { %v602_v27 = vpop.f32.mrb[12].mxu0 }
 0x120   : > { %v604_v28 = vpop.f32.mrb[13].mxu0 }
 0x121   : > { %v715_v29 = vmax.f32 %v602_v27, %v604_v28  ;;  %v1934_v28 = vpack.c.bf16 %v847_v16, %v845_v15 }
 0x123   : > { %v734_v30 = vmax.f32 %v709_v11, %v715_v29  ;;  %v608_v31 = vpop.f32.mrb[14].mxu0  ;;  %v840_v11 = vld [vmem:[%s3429_s3 + $0x200] sm:$0xff] }
 0x124   : > { %v610_v32 = vpop.f32.mrb[15].mxu0  ;;  %v1932_v19 = vpack.c.bf16 %v842_v12, %v840_v11  ;;  %v1325_v11 = vld [vmem:[%s3431_s5 + $0xb8] sm:$0xff] }
 0x125   : > { %v716_v33 = vmax.f32 %v608_v31, %v610_v32  ;;  %v1320_v31 = vld [vmem:[%s3431_s5 + $0x90] sm:$0xff]  ;;  %v1321_v32 = vld [vmem:[%s3431_s5 + $0x98] sm:$0xff] }
 0x127   : > { %v2732_v34 = vmax.f32 %v710_v14, %v716_v33  ;;  %v614_v35 = vpop.f32.mrb[16].mxu0  ;;  %v746_v14 = vadd.f32 %v2763_v7, %v734_v30  ;;  %v1303_v30 = vld [vmem:[%s3431_s5 + $0x8] sm:$0xff] }
 0x128   : > { %v616_v36 = vpop.f32.mrb[17].mxu0 }
 0x129   : > { %v717_v37 = vmax.f32 %v614_v35, %v616_v36  ;;  %v752_v35 = vmax.f32 %v746_v14, 0.0  ;;  %v747_v36 = vadd.f32 %v2763_v7, %v2732_v34  ;;  %v849_v34 = vld [vmem:[%s3429_s3 + $0x248] sm:$0xff]  ;;  %v855_v14 = vld [vmem:[%s3429_s3 + $0x278] sm:$0xff] }
 0x12b   : > { %v2734_v38 = vmax.f32 %v711_v17, %v717_v37  ;;  %v620_v39 = vpop.f32.mrb[18].mxu0  ;;  %v2028_v37 = vpack.c.bf16 %v1303_v30, %v1302_v24 }
 0x12c   : > { %v622_v40 = vpop.f32.mrb[19].mxu0 }
 0x12d   : > { %v718_v41 = vmax.f32 %v620_v39, %v622_v40  ;;  %v2030_v39 = vpack.c.bf16 %v1321_v32, %v1320_v31  ;;  %v1304_v40 = vld [vmem:[%s3431_s5 + $0x10] sm:$0xff]  ;;  %v1326_v31 = vld [vmem:[%s3431_s5 + $0xc0] sm:$0xff]  ;;  %v1327_v32 = vld [vmem:[%s3431_s5 + $0xc8] sm:$0xff] }
 0x12f   : > { %v2736_v42 = vmax.f32 %v712_v20, %v718_v41  ;;  %v626_v43 = vpop.f32.mrb[20].mxu0  ;;  %v844_v20 = vld [vmem:[%s3429_s3 + $0x220] sm:$0xff]  ;;  %v1305_v41 = vld [vmem:[%s3431_s5 + $0x18] sm:$0xff] }
 0x130   : > { %v628_v44 = vpop.f32.mrb[21].mxu0 }
 0x131   : > { %v719_v45 = vmax.f32 %v626_v43, %v628_v44  ;;  %v1322_v43 = vld [vmem:[%s3431_s5 + $0xa0] sm:$0xff] }
 0x133   : > { %v2738_v46 = vmax.f32 %v713_v23, %v719_v45  ;;  %v632_v47 = vpop.f32.mrb[22].mxu0  ;;  %v1319_v23 = vld [vmem:[%s3431_s5 + $0x88] sm:$0xff] }
 0x134   : > { %v634_v48 = vpop.f32.mrb[23].mxu0  ;;  %v2026_v29 = vpack.c.bf16 %v1319_v23, %v1318_v22  ;;  %v1308_v22 = vld [vmem:[%s3431_s5 + $0x30] sm:$0xff]  ;;  %v1309_v23 = vld [vmem:[%s3431_s5 + $0x38] sm:$0xff] }
 0x135   : > { %v720_v49 = vmax.f32 %v632_v47, %v634_v48  ;;  %v851_v47 = vld [vmem:[%s3429_s3 + $0x258] sm:$0xff]  ;;  %v1323_v48 = vld [vmem:[%s3431_s5 + $0xa8] sm:$0xff] }
 0x136   : > { %2027 = vmatprep.subr.bf16.mxu0 %v2026_v29 }
 0x137   : > { %v2740_v50 = vmax.f32 %v714_v26, %v720_v49  ;;  %v638_v51 = vpop.f32.mrb[24].mxu0  ;;  %2029 = vmatpush3.bf16.msra.mxu0 %v2028_v37  ;;  %v2032_v49 = vpack.c.bf16 %v1305_v41, %v1304_v40  ;;  %v1310_v40 = vld [vmem:[%s3431_s5 + $0x40] sm:$0xff]  ;;  %v1311_v41 = vld [vmem:[%s3431_s5 + $0x48] sm:$0xff] }
 0x138   : > { %v640_v52 = vpop.f32.mrb[25].mxu0  ;;  %2031 = vmatprep.subr.bf16.mxu0 %v2030_v39 }
 0x139   : > { %v721_v53 = vmax.f32 %v638_v51, %v640_v52 }
 0x13b   : > { %v644_v54 = vpop.f32.mrb[26].mxu0  ;;  %2033 = vmatpush3.bf16.msra.mxu0 %v2032_v49  ;;  %v1328_v49 = vld [vmem:[%s3431_s5 + $0xd0] sm:$0xff] }
 0x13c   : > { %v646_v55 = vpop.f32.mrb[27].mxu0 }
 0x13d   : > { %v722_v56 = vmax.f32 %v644_v54, %v646_v55  ;;  %v1936_v54 = vpack.c.bf16 %v846_v21, %v844_v20  ;;  %v848_v55 = vld [vmem:[%s3429_s3 + $0x240] sm:$0xff] }
 0x13f   : > { %v650_v57 = vpop.f32.mrb[28].mxu0 }
 0x140   : > { %v652_v58 = vpop.f32.mrb[29].mxu0 }
 0x141   : > { %v723_v59 = vmax.f32 %v650_v57, %v652_v58  ;;  %v1306_v57 = vld [vmem:[%s3431_s5 + $0x20] sm:$0xff]  ;;  %v1307_v58 = vld [vmem:[%s3431_s5 + $0x28] sm:$0xff] }
 0x142   : > { %v2036_v15 = vpack.c.bf16 %v1307_v58, %v1306_v57  ;;  %v1313_v57 = vld [vmem:[%s3431_s5 + $0x58] sm:$0xff] }
 0x143   : > { %v2742_v60 = vpop.f32.mrb[30].mxu0 }
 0x144   : > { %v2744_v61 = vpop.f32.mrb[31].mxu0 }
 0x145   : > { %v724_v62 = vmax.f32 %v2742_v60, %v2744_v61 }
 0x147   : > { %v2748_v63 = vpop.f32.mrb[32].mxu0 }
 0x148   : > { %v2750_v0 = vpop.f32.mrb[33].mxu0 }
 0x149   : > { %v725_v1 = vmax.f32 %v2748_v63, %v2750_v0  ;;  %v856_v63 = vld [vmem:[%s3429_s3 + $0x280] sm:$0xff]  ;;  %v858_v0 = vld [vmem:[%s3429_s3 + $0x290] sm:$0xff] }
 0x14b   : > { %v2754_v2 = vpop.f32.mrb[34].mxu0 }
 0x14c   : > { %v2756_v3 = vpop.f32.mrb[35].mxu0 }
 0x14d   : > { %v726_v4 = vmax.f32 %v2754_v2, %v2756_v3  ;;  %v860_v2 = vld [vmem:[%s3429_s3 + $0x2a0] sm:$0xff]  ;;  %v862_v3 = vld [vmem:[%s3429_s3 + $0x2b0] sm:$0xff] }
 0x14f   : > { %v674_v5 = vpop.f32.mrb[36].mxu0 }
 0x150   : > { %v676_v6 = vpop.f32.mrb[37].mxu0 }
 0x151   : > { %v727_v8 = vmax.f32 %v674_v5, %v676_v6  ;;  %v2842_v6 = vmax.f32 %v747_v36, 0.0 }
 0x153   : > { %v758_v9 = vmax.f32 %v721_v53, %v727_v8  ;;  %v680_v10 = vpop.f32.mrb[38].mxu0  ;;  %v1938_v8 = vpack.c.bf16 %v851_v47, %v849_v34  ;;  %v2042_v34 = vpack.c.bf16 %v1327_v32, %v1326_v31 }
 0x154   : > { %v682_v13 = vpop.f32.mrb[39].mxu0 }
 0x155   : > { %v728_v17 = vmax.f32 %v680_v10, %v682_v13  ;;  %v2779_v18 = vadd.f32 %v2763_v7, %v758_v9  ;;  %v850_v9 = vld [vmem:[%s3429_s3 + $0x250] sm:$0xff]  ;;  %v853_v13 = vld [vmem:[%s3429_s3 + $0x268] sm:$0xff] }
 0x156   : > { %v1324_v10 = vld [vmem:[%s3431_s5 + $0xb0] sm:$0xff]  ;;  %v1940_v20 = vpack.c.bf16 %v850_v9, %v848_v55  ;;  %v1942_v61 = vpack.c.bf16 %v855_v14, %v853_v13  ;;  %v1948_v55 = vpack.c.bf16 %v858_v0, %v856_v63  ;;  %v1952_v9 = vpack.c.bf16 %v862_v3, %v860_v2  ;;  %v889_v0 = vld [vmem:[%s3429_s3 + $0x388] sm:$0xff]  ;;  %v899_v3 = vld [vmem:[%s3429_s3 + $0x3d8] sm:$0xff] }
 0x157   : > { %v759_v25 = vmax.f32 %v722_v56, %v728_v17  ;;  %v686_v26 = vpop.f32.mrb[40].mxu0  ;;  %v770_v27 = vmax.f32 %v2779_v18, 0.0  ;;  %v2034_v56 = vpack.c.bf16 %v1323_v48, %v1322_v43  ;;  %v2038_v21 = vpack.c.bf16 %v1325_v11, %v1324_v10  ;;  %v863_v48 = vld [vmem:[%s3429_s3 + $0x2b8] sm:$0xff]  ;;  %v864_v11 = vld [vmem:[%s3429_s3 + $0x2c0] sm:$0xff]  ;;  %v886_v63 = vld [vmem:[%s3429_s3 + $0x370] sm:$0xff] }
 0x158   : > { %v688_v33 = vpop.f32.mrb[41].mxu0  ;;  %v750_v18 = vadd.f32 %v2763_v7, %v2738_v46  ;;  %v868_v46 = vld [vmem:[%s3429_s3 + $0x2e0] sm:$0xff]  ;;  %v897_v2 = vld [vmem:[%s3429_s3 + $0x3c8] sm:$0xff] }
 0x159   : > { %v765_v44 = vadd.f32 %v2763_v7, %v759_v25  ;;  %v729_v45 = vmax.f32 %v686_v26, %v688_v33  ;;  %1000 = vmatprep.mubr.f32.mxu1 %v770_v27  ;;  %2035 = vmatprep.subr.bf16.mxu0 %v2034_v56  ;;  %v749_v25 = vadd.f32 %v2763_v7, %v2736_v42  ;;  %v854_v26 = vld [vmem:[%s3429_s3 + $0x270] sm:$0xff]  ;;  %v859_v42 = vld [vmem:[%s3429_s3 + $0x298] sm:$0xff] }
 0x15a   : > { %1001 = vmatmul.mubr.f32.vlgmr.msra.gmra.mrb[0].mxu1 %v752_v35  ;;  %2037 = vmatpush3.bf16.msra.mxu0 %v2036_v15  ;;  %v2040_v33 = vpack.c.bf16 %v1309_v23, %v1308_v22  ;;  %v1312_v56 = vld [vmem:[%s3431_s5 + $0x50] sm:$0xff]  ;;  %v872_v23 = vld [vmem:[%s3429_s3 + $0x300] sm:$0xff] }
 0x15b   : > { %v2829_v51 = vmax.f32 %v765_v44, 0.0  ;;  %v760_v52 = vmax.f32 %v723_v59, %v729_v45  ;;  %1933 = vmatpush1.bf16.msra.mxu1 %v1932_v19  ;;  %v692_v53 = vpop.f32.mrb[42].mxu0  ;;  %v748_v59 = vadd.f32 %v2763_v7, %v2734_v38  ;;  %2039 = vmatprep.subr.bf16.mxu0 %v2038_v21  ;;  %v2911_v43 = vmax.f32 %v749_v25, 0.0  ;;  %v870_v15 = vld [vmem:[%s3429_s3 + $0x2f0] sm:$0xff] }
 0x15c   : > { %v694_v5 = vpop.f32.mrb[43].mxu0  ;;  %1935 = vmatprep.subr.bf16.mxu1 %v1934_v28  ;;  %v857_v28 = vld [vmem:[%s3429_s3 + $0x288] sm:$0xff]  ;;  %v1960_v21 = vpack.c.bf16 %v870_v15, %v868_v46  ;;  %v874_v25 = vld [vmem:[%s3429_s3 + $0x310] sm:$0xff]  ;;  %v904_v15 = vld [vmem:[%s3429_s3 + $0x400] sm:$0xff] }
 0x15d   : > { %v766_v12 = vadd.f32 %v2763_v7, %v760_v52  ;;  %v730_v38 = vmax.f32 %v692_v53, %v694_v5  ;;  %1006 = vmatprep.mubr.f32.mxu1 %v2829_v51  ;;  %v2873_v24 = vmax.f32 %v748_v59, 0.0  ;;  %v1946_v45 = vpack.c.bf16 %v859_v42, %v857_v28  ;;  %v1329_v52 = vld [vmem:[%s3431_s5 + $0xd8] sm:$0xff]  ;;  %v865_v59 = vld [vmem:[%s3429_s3 + $0x2c8] sm:$0xff]  ;;  %v876_v28 = vld [vmem:[%s3429_s3 + $0x320] sm:$0xff] }
 0x15e   : > { %1007 = vmatmul.mubr.f32.gmra.mrb[2].mxu1 %v2842_v6  ;;  %2041 = vmatpush3.bf16.msra.mxu0 %v2040_v33  ;;  %v2044_v53 = vpack.c.bf16 %v1311_v41, %v1310_v40  ;;  %v867_v5 = vld [vmem:[%s3429_s3 + $0x2d8] sm:$0xff]  ;;  %v880_v33 = vld [vmem:[%s3429_s3 + $0x340] sm:$0xff] }
 0x15f   : > { %v2862_v16 = vmax.f32 %v766_v12, 0.0  ;;  %v761_v17 = vmax.f32 %v724_v62, %v730_v38  ;;  %1937 = vmatpush1.bf16.msra.mxu1 %v1936_v54  ;;  %v698_v19 = vpop.f32.mrb[44].mxu0  ;;  %v852_v62 = vld [vmem:[%s3429_s3 + $0x260] sm:$0xff]  ;;  %2043 = vmatprep.subr.bf16.mxu0 %v2042_v34  ;;  %v1954_v10 = vpack.c.bf16 %v867_v5, %v865_v59  ;;  %v866_v12 = vld [vmem:[%s3429_s3 + $0x2d0] sm:$0xff]  ;;  %v871_v38 = vld [vmem:[%s3429_s3 + $0x2f8] sm:$0xff]  ;;  %v1986_v59 = vpack.c.bf16 %v899_v3, %v897_v2 }
 0x160   : > { %v700_v60 = vpop.f32.mrb[45].mxu0  ;;  %1939 = vmatprep.subr.bf16.mxu1 %v1938_v8  ;;  %v1944_v39 = vpack.c.bf16 %v854_v26, %v852_v62  ;;  %v2048_v8 = vpack.c.bf16 %v1313_v57, %v1312_v56  ;;  %v1956_v13 = vpack.c.bf16 %v866_v12, %v864_v11  ;;  %v1964_v62 = vpack.c.bf16 %v874_v25, %v872_v23  ;;  %v883_v42 = vld [vmem:[%s3429_s3 + $0x358] sm:$0xff]  ;;  %v892_v57 = vld [vmem:[%s3429_s3 + $0x3a0] sm:$0xff]  ;;  %v930_v2 = vld [vmem:[%s3429_s3 + $0x4d0] sm:$0xff] }
 0x161   : > { %v767_v29 = vadd.f32 %v2763_v7, %v761_v17  ;;  %v731_v30 = vmax.f32 %v698_v19, %v700_v60  ;;  %1012 = vmatprep.mubr.f32.mxu1 %v2862_v16  ;;  %v2982_v17 = vmax.f32 %v750_v18, 0.0  ;;  %v873_v19 = vld [vmem:[%s3429_s3 + $0x308] sm:$0xff]  ;;  %v887_v40 = vld [vmem:[%s3429_s3 + $0x378] sm:$0xff]  ;;  %v896_v5 = vld [vmem:[%s3429_s3 + $0x3c0] sm:$0xff]  ;;  %v751_v3 = vadd.f32 %v2763_v7, %v2740_v50 }
 0x162   : > { %1013 = vmatmul.mubr.f32.gmra.mrb[4].mxu1 %v2873_v24  ;;  %2045 = vmatpush3.bf16.msra.mxu0 %v2044_v53  ;;  %v877_v60 = vld [vmem:[%s3429_s3 + $0x328] sm:$0xff]  ;;  %v895_v53 = vld [vmem:[%s3429_s3 + $0x3b8] sm:$0xff]  ;;  %v900_v18 = vld [vmem:[%s3429_s3 + $0x3e0] sm:$0xff] }
 0x163   : > { %v2898_v35 = vmax.f32 %v767_v29, 0.0  ;;  %v2903_v36 = vmax.f32 %v725_v1, %v731_v30  ;;  %1941 = vmatpush1.bf16.msra.mxu1 %v1940_v20  ;;  %v704_v37 = vpop.f32.mrb[46].mxu0  ;;  %v861_v1 = vld [vmem:[%s3429_s3 + $0x2a8] sm:$0xff]  ;;  %v875_v20 = vld [vmem:[%s3429_s3 + $0x318] sm:$0xff]  ;;  %v878_v29 = vld [vmem:[%s3429_s3 + $0x330] sm:$0xff] }
 0x164   : > { %v706_v44 = vpop.f32.mrb[47].mxu0  ;;  %1943 = vmatprep.subr.bf16.mxu1 %v1942_v61  ;;  %v1950_v58 = vpack.c.bf16 %v863_v48, %v861_v1  ;;  %v1962_v22 = vpack.c.bf16 %v875_v20, %v873_v19  ;;  %v879_v61 = vld [vmem:[%s3429_s3 + $0x338] sm:$0xff]  ;;  %v881_v30 = vld [vmem:[%s3429_s3 + $0x348] sm:$0xff]  ;;  %v1968_v31 = vpack.c.bf16 %v878_v29, %v876_v28  ;;  %v888_v48 = vld [vmem:[%s3429_s3 + $0x380] sm:$0xff] }
 0x165   : > { %v732_v47 = vmax.f32 %v704_v37, %v706_v44  ;;  %1018 = vmatprep.mubr.f32.mxu1 %v2898_v35  ;;  %v1966_v26 = vpack.c.bf16 %v879_v61, %v877_v60  ;;  %v1970_v32 = vpack.c.bf16 %v883_v42, %v881_v30  ;;  %v882_v37 = vld [vmem:[%s3429_s3 + $0x350] sm:$0xff]  ;;  %v891_v1 = vld [vmem:[%s3429_s3 + $0x398] sm:$0xff]  ;;  %v909_v20 = vld [vmem:[%s3429_s3 + $0x428] sm:$0xff]  ;;  %v768_v42 = vadd.f32 %v2763_v7, %v2903_v36 }
 0x166   : > { %1019 = vmatmul.mubr.f32.gmra.mrb[6].mxu1 %v2911_v43  ;;  %v1972_v41 = vpack.c.bf16 %v882_v37, %v880_v33  ;;  %v906_v19 = vld [vmem:[%s3429_s3 + $0x410] sm:$0xff]  ;;  %v908_v25 = vld [vmem:[%s3429_s3 + $0x420] sm:$0xff]  ;;  %v913_v61 = vld [vmem:[%s3429_s3 + $0x448] sm:$0xff] }
 0x167   : > { %v2936_v54 = vmax.f32 %v726_v4, %v732_v47  ;;  %1945 = vmatpush1.bf16.msra.mxu1 %v1944_v39  ;;  %1024 = vmatprep.mubr.f32.mxu1 %v2842_v6  ;;  %v2046_v4 = vpack.c.bf16 %v1329_v52, %v1328_v49  ;;  %v885_v39 = vld [vmem:[%s3429_s3 + $0x368] sm:$0xff]  ;;  %v1978_v47 = vpack.c.bf16 %v891_v1, %v889_v0  ;;  %v890_v49 = vld [vmem:[%s3429_s3 + $0x390] sm:$0xff]  ;;  %v912_v29 = vld [vmem:[%s3429_s3 + $0x440] sm:$0xff] }
 0x168   : > { %1947 = vmatprep.subr.bf16.mxu1 %v1946_v45  ;;  %v1974_v44 = vpack.c.bf16 %v887_v40, %v885_v39  ;;  %v884_v45 = vld [vmem:[%s3429_s3 + $0x360] sm:$0xff]  ;;  %v893_v52 = vld [vmem:[%s3429_s3 + $0x3a8] sm:$0xff]  ;;  %v910_v60 = vld [vmem:[%s3429_s3 + $0x430] sm:$0xff]  ;;  %v3138_v39 = vmax.f32 %v768_v42, 0.0 }
 0x169   : > { %2047 = vmatprep.subr.bf16.mxu0 %v2046_v4  ;;  %v1976_v34 = vpack.c.bf16 %v886_v63, %v884_v45  ;;  %v1982_v56 = vpack.c.bf16 %v895_v53, %v893_v52  ;;  %v914_v30 = vld [vmem:[%s3429_s3 + $0x450] sm:$0xff]  ;;  %v916_v36 = vld [vmem:[%s3429_s3 + $0x460] sm:$0xff]  ;;  %v921_v40 = vld [vmem:[%s3429_s3 + $0x488] sm:$0xff] }
 0x16a   : > { %1025 = vmatmul.mubr.f32.gmra.mrb[8].mxu1 %v770_v27  ;;  %v869_v27 = vld [vmem:[%s3429_s3 + $0x2e8] sm:$0xff]  ;;  %2049 = vmatpush3.bf16.msra.mxu0 %v2048_v8  ;;  %v898_v8 = vld [vmem:[%s3429_s3 + $0x3d0] sm:$0xff]  ;;  %v920_v63 = vld [vmem:[%s3429_s3 + $0x480] sm:$0xff] }
 0x16b   : > { %1949 = vmatpush1.bf16.msra.mxu1 %v1948_v55  ;;  %1030 = vmatprep.mubr.f32.mxu1 %v2873_v24  ;;  %v1958_v14 = vpack.c.bf16 %v871_v38, %v869_v27  ;;  %v1980_v55 = vpack.c.bf16 %v890_v49, %v888_v48  ;;  %v1988_v11 = vpack.c.bf16 %v898_v8, %v896_v5  ;;  %v902_v27 = vld [vmem:[%s3429_s3 + $0x3f0] sm:$0xff]  ;;  %v905_v38 = vld [vmem:[%s3429_s3 + $0x408] sm:$0xff]  ;;  %v924_v49 = vld [vmem:[%s3429_s3 + $0x4a0] sm:$0xff] }
 0x16c   : > { %1951 = vmatprep.subr.bf16.mxu1 %v1950_v58  ;;  %v894_v58 = vld [vmem:[%s3429_s3 + $0x3b0] sm:$0xff]  ;;  %v925_v1 = vld [vmem:[%s3429_s3 + $0x4a8] sm:$0xff]  ;;  %v932_v50 = vld [vmem:[%s3429_s3 + $0x4e0] sm:$0xff] }
 0x16d   : > { %v1984_v4 = vpack.c.bf16 %v894_v58, %v892_v57  ;;  %v918_v37 = vld [vmem:[%s3429_s3 + $0x470] sm:$0xff]  ;;  %v929_v53 = vld [vmem:[%s3429_s3 + $0x4c8] sm:$0xff]  ;;  %v928_v58 = vld [vmem:[%s3429_s3 + $0x4c0] sm:$0xff] }
 0x16e   : > { %1031 = vmatmul.mubr.f32.gmra.mrb[10].mxu1 %v2829_v51  ;;  %v922_v0 = vld [vmem:[%s3429_s3 + $0x490] sm:$0xff] }
 0x16f   : > { %1953 = vmatpush1.bf16.msra.mxu1 %v1952_v9  ;;  %1036 = vmatprep.mubr.f32.mxu1 %v2911_v43  ;;  %v901_v9 = vld [vmem:[%s3429_s3 + $0x3e8] sm:$0xff]  ;;  %v926_v52 = vld [vmem:[%s3429_s3 + $0x4b0] sm:$0xff] }
 0x170   : > { %1955 = vmatprep.subr.bf16.mxu1 %v1954_v10  ;;  %v903_v10 = vld [vmem:[%s3429_s3 + $0x3f8] sm:$0xff]  ;;  %v934_v8 = vld [vmem:[%s3429_s3 + $0x4f0] sm:$0xff] }
 0x171   : > { %v1990_v12 = vpack.c.bf16 %v903_v10, %v901_v9  ;;  %v757_v9 = vmax.f32 %v751_v3, 0.0  ;;  %v2024_v10 = vpack.c.bf16 %v934_v8, %v932_v50  ;;  %v1336_v3 = vld [vmem:[%s3431_s5 + $0x110] sm:$0xff] }
 0x172   : > { %1037 = vmatmul.mubr.f32.gmra.mrb[12].mxu1 %v2862_v16 }
 0x173   : > { %1957 = vmatpush1.bf16.msra.mxu1 %v1956_v13  ;;  %1042 = vmatprep.mubr.f32.mxu1 %v2982_v17  ;;  %v907_v13 = vld [vmem:[%s3429_s3 + $0x418] sm:$0xff] }
 0x174   : > { %1959 = vmatprep.subr.bf16.mxu1 %v1958_v14  ;;  %v1992_v14 = vpack.c.bf16 %v902_v27, %v900_v18  ;;  %v1994_v46 = vpack.c.bf16 %v907_v13, %v905_v38  ;;  %v1332_v18 = vld [vmem:[%s3431_s5 + $0xf0] sm:$0xff]  ;;  %v1333_v27 = vld [vmem:[%s3431_s5 + $0xf8] sm:$0xff] }
 0x175   : > { %v2054_v38 = vpack.c.bf16 %v1333_v27, %v1332_v18  ;;  %v1316_v13 = vld [vmem:[%s3431_s5 + $0x70] sm:$0xff]  ;;  %v1341_v18 = vld [vmem:[%s3431_s5 + $0x138] sm:$0xff]  ;;  %v1358_v27 = vld [vmem:[%s3431_s5 + $0x1c0] sm:$0xff] }
 0x176   : > { %1043 = vmatmul.mubr.f32.gmra.mrb[14].mxu1 %v2898_v35 }
 0x177   : > { %1961 = vmatpush1.bf16.msra.mxu1 %v1960_v21  ;;  %1113 = vmatprep.mubr.f32.mxu1 %v2829_v51  ;;  %v911_v21 = vld [vmem:[%s3429_s3 + $0x438] sm:$0xff] }
 0x178   : > { %1963 = vmatprep.subr.bf16.mxu1 %v1962_v22  ;;  %v1996_v22 = vpack.c.bf16 %v906_v19, %v904_v15  ;;  %v1998_v23 = vpack.c.bf16 %v911_v21, %v909_v20  ;;  %v1350_v15 = vld [vmem:[%s3431_s5 + $0x180] sm:$0xff]  ;;  %v1351_v19 = vld [vmem:[%s3431_s5 + $0x188] sm:$0xff] }
 0x179   : > { %v2058_v20 = vpack.c.bf16 %v1351_v19, %v1350_v15  ;;  %v1343_v15 = vld [vmem:[%s3431_s5 + $0x148] sm:$0xff]  ;;  %v1360_v19 = vld [vmem:[%s3431_s5 + $0x1d0] sm:$0xff] }
 0x17b   : > { %1965 = vmatpush1.bf16.msra.mxu1 %v1964_v62  ;;  %v915_v62 = vld [vmem:[%s3429_s3 + $0x458] sm:$0xff] }
 0x17c   : > { %1967 = vmatprep.subr.bf16.mxu1 %v1966_v26  ;;  %v2000_v26 = vpack.c.bf16 %v910_v60, %v908_v25  ;;  %v2002_v28 = vpack.c.bf16 %v915_v62, %v913_v61 }
 0x17f   : > { %1969 = vmatpush1.bf16.msra.mxu1 %v1968_v31  ;;  %v919_v31 = vld [vmem:[%s3429_s3 + $0x478] sm:$0xff] }
 0x180   : > { %1971 = vmatprep.subr.bf16.mxu1 %v1970_v32  ;;  %v2004_v32 = vpack.c.bf16 %v914_v30, %v912_v29 }
 0x183   : > { %1973 = vmatpush1.bf16.msra.mxu1 %v1972_v41  ;;  %v923_v41 = vld [vmem:[%s3429_s3 + $0x498] sm:$0xff] }
 0x184   : > { %1975 = vmatprep.subr.bf16.mxu1 %v1974_v44  ;;  %v2008_v44 = vpack.c.bf16 %v918_v37, %v916_v36  ;;  %v2010_v45 = vpack.c.bf16 %v923_v41, %v921_v40  ;;  %v3249_v36 = vld [vmem:[%s3430_s4] ss:$0 sm:$0xff] }
 0x187   : > { %1977 = vmatpush1.bf16.msra.mxu1 %v1976_v34  ;;  %v927_v34 = vld [vmem:[%s3429_s3 + $0x4b8] sm:$0xff] }
 0x188   : > { %1979 = vmatprep.subr.bf16.mxu1 %v1978_v47  ;;  %v2012_v47 = vpack.c.bf16 %v922_v0, %v920_v63  ;;  %v2014_v48 = vpack.c.bf16 %v927_v34, %v925_v1  ;;  %v1334_v63 = vld [vmem:[%s3431_s5 + $0x100] sm:$0xff]  ;;  %v1335_v0 = vld [vmem:[%s3431_s5 + $0x108] sm:$0xff] }
 0x18b   : > { %1981 = vmatpush1.bf16.msra.mxu1 %v1980_v55  ;;  %v931_v55 = vld [vmem:[%s3429_s3 + $0x4d8] sm:$0xff] }
 0x18c   : > { %1983 = vmatprep.subr.bf16.mxu1 %v1982_v56  ;;  %v2016_v56 = vpack.c.bf16 %v926_v52, %v924_v49  ;;  %v2018_v57 = vpack.c.bf16 %v931_v55, %v929_v53  ;;  %v2060_v55 = vpack.c.bf16 %v1335_v0, %v1334_v63  ;;  %v2247_v63 = vmov 0.0|0.0  }
 0x18f   : > { %1985 = vmatpush1.bf16.msra.mxu1 %v1984_v4  ;;  %v935_v4 = vld [vmem:[%s3429_s3 + $0x4f8] sm:$0xff] }
 0x190   : > { %1987 = vmatprep.subr.bf16.mxu1 %v1986_v59  ;;  %v2020_v59 = vpack.c.bf16 %v930_v2, %v928_v58 }
 0x193   : > { %1989 = vmatpush1.bf16.msra.mxu1 %v1988_v11  ;;  %v2246_v11 = vmov 0.0  }
 0x194   : > { %1991 = vmatprep.subr.bf16.mxu1 %v1990_v12 }
 0x197   : > { %1993 = vmatpush1.bf16.msra.mxu1 %v1992_v14  ;;  %v1317_v14 = vld [vmem:[%s3431_s5 + $0x78] sm:$0xff] }
 0x198   : > { %1995 = vmatprep.subr.bf16.mxu1 %v1994_v46  ;;  %v2056_v46 = vpack.c.bf16 %v1317_v14, %v1316_v13 }
 0x19a   : > { %1114 = vmatmul.mubr.f32.vlgmr.msra.gmra.mrb[0].mxu1 %v2842_v6  ;;  %v917_v6 = vld [vmem:[%s3429_s3 + $0x468] sm:$0xff] }
 0x19b   : > { %1119 = vmatprep.mubr.f32.mxu1 %v2862_v16  ;;  %1997 = vmatpush1.bf16.msra.mxu1 %v1996_v22  ;;  %v2006_v33 = vpack.c.bf16 %v919_v31, %v917_v6 }
 0x19c   : > { %1999 = vmatprep.subr.bf16.mxu1 %v1998_v23 }
 0x19e   : > { %1120 = vmatmul.mubr.f32.gmra.mrb[2].mxu1 %v2873_v24 }
 0x19f   : > { %1125 = vmatprep.mubr.f32.mxu1 %v2898_v35  ;;  %2001 = vmatpush1.bf16.msra.mxu1 %v2000_v26 }
 0x1a0   : > { %2003 = vmatprep.subr.bf16.mxu1 %v2002_v28 }
 0x1a2   : > { %1126 = vmatmul.mubr.f32.gmra.mrb[4].mxu1 %v2911_v43 }
 0x1a3   : > { %1131 = vmatprep.mubr.f32.mxu1 %v3138_v39  ;;  %2005 = vmatpush1.bf16.msra.mxu1 %v2004_v32 }
 0x1a4   : > { %2007 = vmatprep.subr.bf16.mxu1 %v2006_v33 }
 0x1a6   : > { %1132 = vmatmul.mubr.f32.gmra.mrb[6].mxu1 %v2982_v17 }
 0x1a7   : > { %1137 = vmatprep.mubr.f32.mxu1 %v2873_v24  ;;  %2009 = vmatpush1.bf16.msra.mxu1 %v2008_v44 }
 0x1a8   : > { %2011 = vmatprep.subr.bf16.mxu1 %v2010_v45 }
 0x1aa   : > { %1138 = vmatmul.mubr.f32.gmra.mrb[8].mxu1 %v2829_v51  ;;  %v933_v51 = vld [vmem:[%s3429_s3 + $0x4e8] sm:$0xff] }
 0x1ab   : > { %1143 = vmatprep.mubr.f32.mxu1 %v2911_v43  ;;  %2013 = vmatpush1.bf16.msra.mxu1 %v2012_v47  ;;  %v2022_v5 = vpack.c.bf16 %v935_v4, %v933_v51  ;;  %v1352_v47 = vld [vmem:[%s3431_s5 + $0x190] sm:$0xff]  ;;  %v1337_v51 = vld [vmem:[%s3431_s5 + $0x118] sm:$0xff] }
 0x1ac   : > { %2015 = vmatprep.subr.bf16.mxu1 %v2014_v48  ;;  %v1353_v48 = vld [vmem:[%s3431_s5 + $0x198] sm:$0xff]  ;;  %v2064_v8 = vpack.c.bf16 %v1337_v51, %v1336_v3 }
 0x1ad   : > { %v2062_v2 = vpack.c.bf16 %v1353_v48, %v1352_v47  ;;  %v1519_v47 = vld [vmem:[%s3433_s7 + $0x28] sm:$0xff] }
 0x1ae   : > { %1144 = vmatmul.mubr.f32.gmra.mrb[10].mxu1 %v2862_v16 }
 0x1af   : > { %1149 = vmatprep.mubr.f32.mxu1 %v2982_v17  ;;  %2017 = vmatpush1.bf16.msra.mxu1 %v2016_v56 }
 0x1b0   : > { %2019 = vmatprep.subr.bf16.mxu1 %v2018_v57 }
 0x1b2   : > { %1150 = vmatmul.mubr.f32.gmra.mrb[12].mxu1 %v2898_v35 }
 0x1b3   : > { %1155 = vmatprep.mubr.f32.mxu1 %v757_v9  ;;  %2021 = vmatpush1.bf16.msra.mxu1 %v2020_v59  ;;  %v1354_v59 = vld [vmem:[%s3431_s5 + $0x1a0] sm:$0xff] }
 0x1b4   : > { %2023 = vmatprep.subr.bf16.mxu1 %v2022_v5  ;;  %v1355_v5 = vld [vmem:[%s3431_s5 + $0x1a8] sm:$0xff] }
 0x1b6   : > { %1156 = vmatmul.mubr.f32.gmra.mrb[14].mxu1 %v3138_v39 }
 0x1b7   : > { %2025 = vmatpush1.bf16.msra.mxu1 %v2024_v10  ;;  %1226 = vmatprep.mubr.f32.mxu1 %v2246_v11  ;;  %v1338_v10 = vld [vmem:[%s3431_s5 + $0x120] sm:$0xff] }
 0x1ba   : > { %1227 = vmatmul.mubr.f32.vlgmr.msra.gmra.mrb[0].mxu1 %v2873_v24  ;;  %v769_v24 = vadd.f32 %v2763_v7, %v2936_v54  ;;  %v1314_v7 = vld [vmem:[%s3431_s5 + $0x60] sm:$0xff]  ;;  %v1315_v54 = vld [vmem:[%s3431_s5 + $0x68] sm:$0xff] }
 0x1bb   : > { %1232 = vmatprep.mubr.f32.mxu1 %v2246_v11  ;;  %v2052_v12 = vpack.c.bf16 %v1315_v54, %v1314_v7 }
 0x1be   : > { %1233 = vmatmul.mubr.f32.gmra.mrb[2].mxu1 %v2911_v43  ;;  %v775_v43 = vmax.f32 %v769_v24, 0.0  ;;  %v1339_v24 = vld [vmem:[%s3431_s5 + $0x128] sm:$0xff] }
 0x1bf   : > { %1238 = vmatprep.mubr.f32.mxu1 %v2246_v11  ;;  %v2068_v7 = vpack.c.bf16 %v1339_v24, %v1338_v10 }
 0x1c2   : > { %1239 = vmatmul.mubr.f32.gmra.mrb[4].mxu1 %v2982_v17  ;;  %v1330_v17 = vld [vmem:[%s3431_s5 + $0xe0] sm:$0xff] }
 0x1c3   : > { %1244 = vmatprep.mubr.f32.mxu1 %v2246_v11 }
 0x1c6   : > { %1245 = vmatmul.mubr.f32.gmra.mrb[6].mxu1 %v757_v9  ;;  %v2066_v9 = vpack.c.bf16 %v1355_v5, %v1354_v59 }
 0x1c7   : > { %1250 = vmatprep.mubr.f32.mxu1 %v2246_v11 }
 0x1ca   : > { %1251 = vmatmul.mubr.f32.gmra.mrb[8].mxu1 %v2862_v16  ;;  %v1331_v16 = vld [vmem:[%s3431_s5 + $0xe8] sm:$0xff] }
 0x1cb   : > { %1256 = vmatprep.mubr.f32.mxu1 %v2246_v11 }
 0x1ce   : > { %1257 = vmatmul.mubr.f32.gmra.mrb[10].mxu1 %v2898_v35  ;;  %v2050_v35 = vpack.c.bf16 %v1331_v16, %v1330_v17  ;;  %v1356_v17 = vld [vmem:[%s3431_s5 + $0x1b0] sm:$0xff]  ;;  %v1357_v16 = vld [vmem:[%s3431_s5 + $0x1b8] sm:$0xff] }
 0x1cf   : > { %1262 = vmatprep.mubr.f32.mxu1 %v2246_v11  ;;  %v2070_v54 = vpack.c.bf16 %v1357_v16, %v1356_v17 }
 0x1d0   : > { %2051 = vmatprep.subr.bf16.mxu0 %v2050_v35 }
 0x1d1   : > { %2053 = vmatpush3.bf16.msra.mxu0 %v2052_v12  ;;  %v1340_v12 = vld [vmem:[%s3431_s5 + $0x130] sm:$0xff] }
 0x1d2   : > { %1263 = vmatmul.mubr.f32.gmra.mrb[12].mxu1 %v3138_v39  ;;  %2055 = vmatprep.subr.bf16.mxu0 %v2054_v38  ;;  %v1359_v38 = vld [vmem:[%s3431_s5 + $0x1c8] sm:$0xff]  ;;  %v2072_v13 = vpack.c.bf16 %v1341_v18, %v1340_v12 }
 0x1d3   : > { %1268 = vmatprep.mubr.f32.mxu1 %v2246_v11  ;;  %v2074_v14 = vpack.c.bf16 %v1359_v38, %v1358_v27 }
 0x1d5   : > { %2057 = vmatpush3.bf16.msra.mxu0 %v2056_v46  ;;  %v1342_v46 = vld [vmem:[%s3431_s5 + $0x140] sm:$0xff] }
 0x1d6   : > { %1269 = vmatmul.mubr.f32.gmra.mrb[14].mxu1 %v775_v43  ;;  %2059 = vmatprep.subr.bf16.mxu0 %v2058_v20  ;;  %v1361_v20 = vld [vmem:[%s3431_s5 + $0x1d8] sm:$0xff] }
 0x28d   : > { %v1228_v21 = vpop.f32.mrb[0].mxu1 }
 0x28e   : > { %v1230_v22 = vpop.f32.mrb[1].mxu1 }
 0x291   : > { %v1234_v23 = vpop.f32.mrb[2].mxu1 }
 0x292   : > { %v1236_v25 = vpop.f32.mrb[3].mxu1 }
 0x295   : > { %v1240_v60 = vpop.f32.mrb[4].mxu1 }
 0x296   : > { %v1242_v61 = vpop.f32.mrb[5].mxu1 }
 0x299   : > { %v1246_v62 = vpop.f32.mrb[6].mxu1 }
 0x29a   : > { %v1248_v26 = vpop.f32.mrb[7].mxu1 }
 0x29d   : > { %v1252_v28 = vpop.f32.mrb[8].mxu1 }
 0x29e   : > { %v1275_v29 = vmax.f32 %v1228_v21, %v1252_v28  ;;  %v1254_v30 = vpop.f32.mrb[9].mxu1  ;;  %v2076_v21 = vpack.c.bf16 %v1343_v15, %v1342_v46  ;;  %v1346_v28 = vld [vmem:[%s3431_s5 + $0x160] sm:$0xff] }
 0x29f   : > { %v1276_v42 = vmax.f32 %v1230_v22, %v1254_v30  ;;  %v2078_v22 = vpack.c.bf16 %v1361_v20, %v1360_v19  ;;  %v1364_v30 = vld [vmem:[%s3431_s5 + $0x1f0] sm:$0xff] }
 0x2a1   : > { %v1283_v6 = vmax.f32 %v1275_v29, %v1276_v42  ;;  %v1258_v31 = vpop.f32.mrb[10].mxu1  ;;  %v1347_v29 = vld [vmem:[%s3431_s5 + $0x168] sm:$0xff]  ;;  %v1365_v42 = vld [vmem:[%s3431_s5 + $0x1f8] sm:$0xff] }
 0x2a2   : > { %v1277_v32 = vmax.f32 %v1234_v23, %v1258_v31  ;;  %v1260_v33 = vpop.f32.mrb[11].mxu1  ;;  %v1344_v23 = vld [vmem:[%s3431_s5 + $0x150] sm:$0xff]  ;;  %v2086_v31 = vpack.c.bf16 %v1365_v42, %v1364_v30 }
 0x2a3   : > { %v1278_v37 = vmax.f32 %v1236_v25, %v1260_v33  ;;  %v1294_v41 = vadd.f32 %v3249_v36, %v1283_v6  ;;  %v1345_v25 = vld [vmem:[%s3431_s5 + $0x158] sm:$0xff]  ;;  %v2084_v6 = vpack.c.bf16 %v1347_v29, %v1346_v28 }
 0x2a4   : > { %v1349_v33 = vld [vmem:[%s3431_s5 + $0x178] sm:$0xff] }
 0x2a5   : > { %v1284_v39 = vmax.f32 %v1277_v32, %v1278_v37  ;;  %v1264_v40 = vpop.f32.mrb[12].mxu1  ;;  %v1298_v56 = vmax.f32 %v1294_v41, 0.0  ;;  %v1348_v32 = vld [vmem:[%s3431_s5 + $0x170] sm:$0xff]  ;;  %v1514_v41 = vld [vmem:[%s3433_s7] sm:$0xff] }
 0x2a6   : > { %v1279_v44 = vmax.f32 %v1240_v60, %v1264_v40  ;;  %v1266_v45 = vpop.f32.mrb[13].mxu1  ;;  %v1362_v60 = vld [vmem:[%s3431_s5 + $0x1e0] sm:$0xff]  ;;  %v2088_v37 = vpack.c.bf16 %v1349_v33, %v1348_v32 }
 0x2a7   : > { %v1280_v1 = vmax.f32 %v1242_v61, %v1266_v45  ;;  %v1295_v34 = vadd.f32 %v3249_v36, %v1284_v39  ;;  %v1363_v61 = vld [vmem:[%s3431_s5 + $0x1e8] sm:$0xff]  ;;  %v1516_v45 = vld [vmem:[%s3433_s7 + $0x10] sm:$0xff] }
 0x2a9   : > { %v3265_v49 = vmax.f32 %v1279_v44, %v1280_v1  ;;  %v1270_v52 = vpop.f32.mrb[14].mxu1  ;;  %v1299_v53 = vmax.f32 %v1295_v34, 0.0  ;;  %v1515_v44 = vld [vmem:[%s3433_s7 + $0x8] sm:$0xff]  ;;  %v1518_v34 = vld [vmem:[%s3433_s7 + $0x20] sm:$0xff] }
 0x2aa   : > { %v1281_v57 = vmax.f32 %v1246_v62, %v1270_v52  ;;  %v1272_v58 = vpop.f32.mrb[15].mxu1  ;;  %v2080_v62 = vpack.c.bf16 %v1345_v25, %v1344_v23  ;;  %v2091_v0 = vpack.c.bf16 %v1515_v44, %v1514_v41  ;;  %v2097_v48 = vpack.c.bf16 %v1519_v47, %v1518_v34  ;;  %v1521_v52 = vld [vmem:[%s3433_s7 + $0x38] sm:$0xff] }
 0x2ab   : > { %v1282_v4 = vmax.f32 %v1248_v26, %v1272_v58  ;;  %1437 = vmatprep.mubr.f32.mxu0 %v1299_v53  ;;  %v2082_v26 = vpack.c.bf16 %v1363_v61, %v1362_v60  ;;  %v1296_v39 = vadd.f32 %v3249_v36, %v3265_v49  ;;  %v1520_v49 = vld [vmem:[%s3433_s7 + $0x30] sm:$0xff]  ;;  %v1722_v58 = vld [vmem:[%s3432_s6] ss:$0 sm:$0xff] }
 0x2ac   : > { %1438 = vmatmul.mubr.f32.vlgmr.msra.gmra.mrb[48].mxu0 %v1298_v56  ;;  %v2100_v53 = vpack.c.bf16 %v1521_v52, %v1520_v49 }
 0x2ad   : > { %v1286_v50 = vmax.f32 %v1281_v57, %v1282_v4  ;;  %2061 = vmatpush3.bf16.msra.mxu0 %v2060_v55  ;;  %v1300_v40 = vmax.f32 %v1296_v39, 0.0 }
 0x2ae   : > { %2063 = vmatprep.subr.bf16.mxu0 %v2062_v2 }
 0x2af   : > { %v1297_v43 = vadd.f32 %v3249_v36, %v1286_v50  ;;  %v1517_v36 = vld [vmem:[%s3433_s7 + $0x18] sm:$0xff] }
 0x2b0   : > { %v2094_v1 = vpack.c.bf16 %v1517_v36, %v1516_v45 }
 0x2b1   : > { %2065 = vmatpush3.bf16.msra.mxu0 %v2064_v8  ;;  %v1301_v35 = vmax.f32 %v1297_v43, 0.0 }
 0x2b2   : > { %2067 = vmatprep.subr.bf16.mxu0 %v2066_v9 }
 0x2b3   : > { %1507 = vmatprep.mubr.f32.mxu0 %v1301_v35 }
 0x2b5   : > { %2069 = vmatpush3.bf16.msra.mxu0 %v2068_v7 }
 0x2b6   : > { %2071 = vmatprep.subr.bf16.mxu0 %v2070_v54 }
 0x2b9   : > { %2073 = vmatpush3.bf16.msra.mxu0 %v2072_v13 }
 0x2ba   : > { %2075 = vmatprep.subr.bf16.mxu0 %v2074_v14 }
 0x2bd   : > { %2077 = vmatpush3.bf16.msra.mxu0 %v2076_v21 }
 0x2be   : > { %2079 = vmatprep.subr.bf16.mxu0 %v2078_v22 }
 0x2c1   : > { %2081 = vmatpush3.bf16.msra.mxu0 %v2080_v62 }
 0x2c2   : > { %2083 = vmatprep.subr.bf16.mxu0 %v2082_v26 }
 0x2c5   : > { %2085 = vmatpush3.bf16.msra.mxu0 %v2084_v6 }
 0x2c6   : > { %2087 = vmatprep.subr.bf16.mxu0 %v2086_v31 }
 0x2c9   : > { %2089 = vmatpush3.bf16.msra.mxu0 %v2088_v37 }
 0x2ca   : > { %2090 = vmatprep.subr.bf16.mxu0 %v2247_v63 }
 0x2cc   : > { %1508 = vmatmul.mubr.f32.vlgmr.msra.gmra.mrb[50].mxu0 %v1300_v40 }
 0x2cd   : > { %2092 = vmatpush3.bf16.msra.mxu0 %v2091_v0  ;;  %1825 = vmatprep.mubr.msk.f32.mxu0 %vm2248_vm4, %v2246_v11  ;;  %v1723_v11 = vld [vmem:[%s3434_s8] ss:$0 sm:$0xff] }
 0x2ce   : > { %2093 = vmatprep.subr.bf16.mxu0 %v2247_v63 }
 0x2d1   : > { %2095 = vmatpush3.bf16.msra.mxu0 %v2094_v1 }
 0x2d2   : > { %2096 = vmatprep.subr.bf16.mxu0 %v2247_v63 }
 0x2d5   : > { %2098 = vmatpush3.bf16.msra.mxu0 %v2097_v48 }
 0x2d6   : > { %2099 = vmatprep.subr.bf16.mxu0 %v2247_v63 }
 0x2d9   : > { %2101 = vmatpush3.bf16.msra.mxu0 %v2100_v53 }
 0x37f   : > { %v1762_v55 = vpop.f32.mrb[48].mxu0 }
 0x380   : > { %v1763_v56 = vpop.f32.mrb[49].mxu0 }
 0x381   : > { %v1764_v57 = vadd.f32 %v1763_v56, %v1762_v55 }
 0x383   : > { %v1440_v51 = vadd.f32 %v1764_v57, %v1722_v58 }
 0x39f   : > { %v1797_v2 = vpop.f32.mrb[50].mxu0 }
 0x3a0   : > { %v1798_v3 = vpop.f32.mrb[51].mxu0 }
 0x3a1   : > { %v1799_v4 = vadd.f32 %v1798_v3, %v1797_v2 }
 0x3a3   : > { %v1510_v59 = vadd.f32 %v1799_v4, %v1440_v51 }
 0x3a5   : > { %v1513_v5 = vmax.f32 %v1510_v59, 0.0 }
 0x3a7   : > { %1826 = vmatmul.mubr.msk.f32.vlgmr.msra.gmra.mrb[52].mxu0 %vm1529_vm5, %v1513_v5 }
 0x47a   : > { %v1599_v50 = vpop.f32.mrb[52].mxu0 }
 0x47b   : > { %v1600_v8 = vadd.f32 %v1723_v11, %v1599_v50  ;;  %v1827_v9 = vpop.f32.mrb[53].mxu0 }
 0x47d   : > { %1603 = vmax.xlane.f32.xlu0 %v1600_v8 }
 0x50a   : > { %v1604_v10 = vpop.xlane.xlu0 %1603 }
 0x50b   : > { %v1605_v24 = vsub.f32 %v1600_v8, %v1604_v10 }
 0x50d   : > { %v1606_v43 = vmul.f32 1.442695, %v1605_v24 }
 0x50f   : > { %2177 = vpow2.f32 %v1606_v43 }
 0x519   : > { %v2178_v17 = vpop.eup %2177 }
 0x51a   : > { %1608 = vadd.xlane.f32.xlu0 %v2178_v17 }
 0x5a7   : > { %v1609_v16 = vpop.xlane.xlu0 %1608 }
 0x5a8   : > { %2179 = vlog2.f32 %v1609_v16 }
 0x5b2   : > { %v2180_v35 = vpop.eup %2179 }
 0x5b3   : > { %v1611_v7 = vmul.f32 0.6931472, %v2180_v35 }
 0x5b5   : > { %v1612_v54 = vsub.f32 %v1605_v24, %v1611_v7 }
 0x5b7   : > { %1613 = vst [vmem:[%s328_s26] sm:$0xff] %v1612_v54 }
 0x5b8   : > { %2194 = shalt.err (!%p2191_p3)
}
 0x5b9   : > { %s2195_s24 = scalar_lea.hbm %s3384_s28, 128  ;;  %s2199_s26 = scalar_lea.hbm %s3435_s9, 256 }
 0x5ba   : > { %p2196_p4 = scmp.ne.s32.totalorder %s3384_s28, %s2195_s24  ;;  %p2200_p9 = scmp.lt.u32.totalorder %s3384_s28, %s3435_s9 }
 0x5bb   : > { %p2201_p10 = scmp.lt.u32.totalorder %s2199_s26, %s2195_s24  ;;  %p2203_p12 = scmp.lt.u32.totalorder %s2195_s24, %s3384_s28 }
 0x5bc   : > { %p2197_p7 = pnand %p2196_p4, %p2338_p5 }
 0x5bd   : > { %p2202_p11 = por %p2201_p10, %p2200_p9 }
 0x5be   : > { %p2198_p8 = pneg %p2197_p7 }
 0x5bf   : > { %p2204_p13 = por %p2203_p12, %p2202_p11 }
 0x5c1   : > { %p2205_p0 = pnand %p2204_p13, %p2198_p8 }
 0x5c3   : > { %2208 = shalt.err (!%p2205_p0)
}
 0x5c4   : > { %2134 = dma.vmem_to_hbm [thread:$0]  (%p2338_p5), %s3386_s23, 128, %s3384_s28, %s1615_s16  }
 0x5c5 PF: > { %p2140_p1 = scmp.ge.s32.totalorder %s2243_s12, 2  ;;  %s1640_s17 = sand.u32 1, %s2231_s30  }
 0x5c6   : > { %s1641_s13 = scalar_lea.sflag [#allocation3], %s1640_s17 }
 0x5c7   : > { %p2137_p2 = pnand %p2140_p1, %p2342_p6 }
 0x5c9   : > { %2226 = dma.done.wait (!%p2137_p2), %s1641_s13, 128  }
 0x5ca   : > { %2228 = vsyncadd (!%p2137_p2), %s1641_s13, 4294967168  ;;  %p19_p3 = scmp.ge.s32.totalorder %s2325_s15, 4   ;;  %s3438_s30 = smov %s2235_s10 }
 0x5cb   : > { %s3439_s10 = smov %s2239_s11  ;;  %s3440_s11 = smov %s2336_s18 }
 0x5cc   : > { %s3441_s12 = smov %s2325_s15  ;;  %21 = sbr.rel (!%p19_p3) target bundleno = 3 (0x3), region = 91 }
 0x5d3   :  { %1646 = vsyncpa [#allocation3], 1 }
 0x5d4   :  { %1648 = vsyncpa [#allocation3 + $0x1], 1 }

</bundles_post_ra>
